<compile_context>
chip_gen: v7x
topology: tpu7x:2x2x1
jax: 0.10.0
libtpu: 0.0.40
codegen_flags: <defaults>
</compile_context>

<pallas_src>
import functools

import jax
import jax.numpy as jnp
from jax.experimental import pallas as pl
from jax.experimental.pallas import tpu as pltpu

WINDOW_SIZE = 11
SIGMA = 1.5


def _gaussian_1d(window_size=WINDOW_SIZE, sigma=SIGMA):
    """Normalized 1D Gaussian, identical to gaussian() in the torch code."""
    xs = jnp.arange(window_size, dtype=jnp.float32)
    g = jnp.exp(-((xs - window_size // 2) ** 2) / (2.0 * sigma ** 2))
    return g / jnp.sum(g)


def _band_matrix(g1d, size, out_size):
    """Row-band matrix M (size, size): M[r, r+i] = g[i] for r < out_size.

    (M @ X) computes the valid 1D conv of X's rows with g (rows >= out_size
    are zero so results stay lane/sublane aligned at the full size)."""
    ws = g1d.shape[0]
    rows = jnp.arange(size)[:, None]
    cols = jnp.arange(size)[None, :]
    offset = cols - rows
    in_band = (offset >= 0) & (offset < ws) & (rows < out_size)
    w = g1d[jnp.clip(offset, 0, ws - 1)]
    return jnp.where(in_band, w, 0.0).astype(jnp.float32)


def _ssim_kernel(c_ref, gh_ref, gv_ref, img1_ref, img2_ref, out_ref, *,
                 maps_per_step, out_h, out_w):
    """One grid step handles `maps_per_step` (= nb*C) channel maps of (H, W)."""
    c1 = c_ref[0]
    c2 = c_ref[1]
    gh = gh_ref[...]                     # (W, W) column-band: right-multiply
    gv = gv_ref[...]                     # (H, H) row-band:    left-multiply
    H = gv.shape[0]
    W = gh.shape[0]
    cb = maps_per_step
    # fp32 contract precision: bf16 single-pass breaks the sigma cancellation,
    # and Mosaic's dot lowering does not expose a bf16x3 (HIGH) mode.
    prec = jax.lax.Precision.HIGHEST

    x1 = img1_ref[...].astype(jnp.float32)   # (cb, H, W), cast in VMEM
    x2 = img2_ref[...].astype(jnp.float32)

    # ---- Stage 1: horizontal valid conv — ONE matmul for all 5*cb maps. ----
    # Maps stacked along sublanes; rows [m*H, (m+1)*H) hold map m with
    # m = map_type * cb + channel, map_type in {x1, x2, x1^2, x2^2, x1*x2}.
    stacked = jnp.concatenate([x1, x2, x1 * x1, x2 * x2, x1 * x2], axis=0)
    r1 = jnp.dot(stacked.reshape(5 * cb * H, W), gh,
                 preferred_element_type=jnp.float32, precision=prec)
    r1 = r1.reshape(5 * cb, H, W)

    # ---- Stage 2: vertical valid conv — ONE matmul for all 5*cb maps. ----
    # Maps re-laid out along lanes: columns [m*W, (m+1)*W) hold map m.
    cols = jnp.concatenate([r1[m] for m in range(5 * cb)], axis=1)  # (H, 5cbW)
    r2 = jnp.dot(gv, cols, preferred_element_type=jnp.float32, precision=prec)

    # Per-type groups, each (H, cb*W); channel ch lives at lanes [ch*W,(ch+1)*W)
    # in every group, so the elementwise SSIM math lines up pixel-for-pixel.
    gw = cb * W
    mu1 = r2[:, 0 * gw:1 * gw]
    mu2 = r2[:, 1 * gw:2 * gw]
    s11 = r2[:, 2 * gw:3 * gw]
    s22 = r2[:, 3 * gw:4 * gw]
    s12 = r2[:, 4 * gw:5 * gw]

    mu1_sq = mu1 * mu1
    mu2_sq = mu2 * mu2
    mu1_mu2 = mu1 * mu2
    sigma1_sq = s11 - mu1_sq
    sigma2_sq = s22 - mu2_sq
    sigma12 = s12 - mu1_mu2

    v1 = 2.0 * sigma12 + c2
    v2 = sigma1_sq + sigma2_sq + c2
    num = (2.0 * mu1_mu2 + c1) * v1
    den = (mu1_sq + mu2_sq + c1) * v2
    ssim_map = num * pl.reciprocal(den, approx=False)   # divide off the VPU slot

    # Validity mask for the zero-padded "valid" conv region (rows < out_h and
    # in-map column < out_w), tiled across the cb lane groups as f32 0/1.
    row = jax.lax.broadcasted_iota(jnp.int32, (H, W), 0)
    col = jax.lax.broadcasted_iota(jnp.int32, (H, W), 1)
    base_valid = ((row < out_h) & (col < out_w)).astype(jnp.float32)
    valid = jnp.concatenate([base_valid] * cb, axis=1)   # (H, cb*W)

    total = jnp.sum(ssim_map * valid)

    # Lane-dense partial-sum slab (wrapper reads element [0, 0] per step).
    out_ref[...] = jnp.full((8, 128), total, dtype=jnp.float32)


def _pick_batch_fold(n, per_elem_bytes, budget_bytes):
    """Largest divisor nb of n whose input block fits `budget_bytes`, while
    keeping at least two grid steps when n >= 2 (keeps both v7x TCs busy)."""
    max_nb = max(1, min(n, budget_bytes // max(per_elem_bytes, 1)))
    for cand in range(max_nb, 0, -1):
        if n % cand != 0:
            continue
        if n // cand >= 2 or n == 1:
            return cand
    return 1


def ssim_pallas(img1, img2, window_size=WINDOW_SIZE, val_range=None):
    """Reproduces SSIM(window_size=11, size_average=True)(img1, img2)."""
    N, C, H, W = img1.shape
    real_ws = min(window_size, H, W)
    out_h = H - real_ws + 1
    out_w = W - real_ws + 1

    # Dynamic-range selection (val_range=None branch of the torch code).  Pass
    # val_range explicitly for normalized inputs to skip this extra HBM pass.
    if val_range is None:
        max_val = jnp.where(jnp.max(img1) > 128.0, 255.0, 1.0)
        min_val = jnp.where(jnp.min(img1) < -0.5, -1.0, 0.0)
        L = (max_val - min_val).astype(jnp.float32)
    else:
        L = jnp.float32(val_range)
    c1 = (0.01 * L) ** 2
    c2 = (0.03 * L) ** 2
    cvals = jnp.stack([c1, c2]).astype(jnp.float32)

    g1d = _gaussian_1d(real_ws, SIGMA)
    gv = _band_matrix(g1d, H, out_h)        # (H, H): vertical valid conv (left)
    gh = _band_matrix(g1d, W, out_w).T      # (W, W): horizontal valid conv (right)

    # Fold several batch elements per grid step for small images; keep >= 2
    # parallel grid steps when N >= 2.
    itemsize = img1.dtype.itemsize
    per_elem_bytes = 2 * C * H * W * itemsize
    nb = _pick_batch_fold(N, per_elem_bytes, 8 * 1024 * 1024)
    cb = nb * C
    steps = N // nb

    # Images are DMA'd in their native dtype; the f32 cast happens in-kernel.
    img1r = img1.reshape(N * C, H, W)
    img2r = img2.reshape(N * C, H, W)

    # Generation-aware VMEM limit: double-buffered input blocks + band matrices
    # + a generous estimate of the live f32 temporaries, clamped to capacity.
    w_pad = -(-W // 128) * 128
    h_pad = -(-H // 8) * 8
    plane = cb * h_pad * w_pad * 4
    est = (2 * 2 * cb * H * W * itemsize          # double-buffered image blocks
           + 2 * (H * H + W * W) * 4              # band matrices
           + 32 * plane)                          # live f32 temporaries
    try:
        cap = int(pltpu.get_tpu_info().vmem_capacity_bytes) * 3 // 4
    except Exception:
        cap = 96 * 1024 * 1024
    vmem_limit = int(min(max(est, 32 * 1024 * 1024), max(cap, 32 * 1024 * 1024)))

    kernel = functools.partial(
        _ssim_kernel, maps_per_step=cb, out_h=out_h, out_w=out_w)

    # TODO(synk): for large images whose (cb, H, W) blocks overflow the VMEM
    # budget (esp. v7x's 64 MiB), tile H with a (real_ws-1)-row halo and build
    # per-tile (tile_h, tile_h + ws - 1) band matrices instead of dense ones.
    partial_sums = pl.pallas_call(
        kernel,
        out_shape=jax.ShapeDtypeStruct((steps, 8, 128), jnp.float32),
        grid_spec=pltpu.PrefetchScalarGridSpec(
            num_scalar_prefetch=0,
            grid=(steps,),
            in_specs=[
                pl.BlockSpec(memory_space=pltpu.MemorySpace.SMEM),   # (C1, C2)
                pl.BlockSpec((W, W), lambda n: (0, 0)),              # Gh
                pl.BlockSpec((H, H), lambda n: (0, 0)),              # Gv
                pl.BlockSpec((cb, H, W), lambda n: (n, 0, 0)),       # img1 block
                pl.BlockSpec((cb, H, W), lambda n: (n, 0, 0)),       # img2 block
            ],
            out_specs=pl.BlockSpec((None, 8, 128), lambda n: (n, 0, 0)),
        ),
        compiler_params=pltpu.CompilerParams(
            dimension_semantics=("parallel",),
            vmem_limit_bytes=vmem_limit),
    )(cvals, gh, gv, img1r, img2r)

    total = jnp.sum(partial_sums[:, 0, 0])
    return total / jnp.float32(N * C * out_h * out_w)


def ssim_reference(img1, img2, window_size=WINDOW_SIZE):
    """Pure-JAX reference mirroring the torch ssim() for verification."""
    N, C, H, W = img1.shape
    real_ws = min(window_size, H, W)
    g = _gaussian_1d(real_ws, SIGMA)
    w2d = jnp.outer(g, g)
    k = jnp.broadcast_to(w2d, (C, 1, real_ws, real_ws))

    img1f = img1.astype(jnp.float32)
    img2f = img2.astype(jnp.float32)

    def conv(x):
        return jax.lax.conv_general_dilated(
            x, k, window_strides=(1, 1), padding="VALID",
            dimension_numbers=("NCHW", "OIHW", "NCHW"),
            feature_group_count=C,
            precision=jax.lax.Precision.HIGHEST)

    max_val = jnp.where(jnp.max(img1) > 128.0, 255.0, 1.0)
    min_val = jnp.where(jnp.min(img1) < -0.5, -1.0, 0.0)
    L = max_val - min_val
    mu1, mu2 = conv(img1f), conv(img2f)
    mu1_sq, mu2_sq, mu1_mu2 = mu1 * mu1, mu2 * mu2, mu1 * mu2
    sigma1_sq = conv(img1f * img1f) - mu1_sq
    sigma2_sq = conv(img2f * img2f) - mu2_sq
    sigma12 = conv(img1f * img2f) - mu1_mu2
    C1, C2 = (0.01 * L) ** 2, (0.03 * L) ** 2
    v1 = 2.0 * sigma12 + C2
    v2 = sigma1_sq + sigma2_sq + C2
    ssim_map = (2 * mu1_mu2 + C1) * v1 / ((mu1_sq + mu2_sq + C1) * v2)
    return jnp.mean(ssim_map)


if __name__ == "__main__":
    key = jax.random.PRNGKey(0)
    k1, k2 = jax.random.split(key)
    # Small image-like inputs in [0, 1] (so L = 1, as in the torch code path).
    img1 = jax.random.uniform(k1, (2, 3, 16, 16), dtype=jnp.float32)
    img2 = jax.random.uniform(k2, (2, 3, 16, 16), dtype=jnp.float32)

    out = jax.block_until_ready(ssim_pallas(img1, img2))
    ref = jax.block_until_ready(ssim_reference(img1, img2))
    assert jnp.allclose(out, ref, rtol=1e-4, atol=1e-4), (out, ref)

    print("KERNEL_OK")
</pallas_src>

<mosaic_0001>
module attributes {stable_mosaic.version = 11 : i64} {
  func.func @_ssim_kernel(%arg0: i32, %arg1: memref<2xf32, #tpu.memory_space<smem>>, %arg2: memref<16x16xf32, #tpu.memory_space<vmem>>, %arg3: memref<16x16xf32, #tpu.memory_space<vmem>>, %arg4: memref<3x16x16xf32, #tpu.memory_space<vmem>>, %arg5: memref<3x16x16xf32, #tpu.memory_space<vmem>>, %arg6: memref<1x8x128xf32, #tpu.memory_space<vmem>>) attributes {dimension_semantics = [#tpu.dimension_semantics<parallel>], iteration_bounds = array<i64: 2>, scalar_prefetch = 0 : i64, scratch_operands = 0 : i64, tpu.core_type = #tpu.core_type<tc>, window_params = [{transform_indices = @transform_0, window_bounds = array<i64: 2>}, {pipeline_mode = #tpu.pipeline_mode<synchronous>, transform_indices = @transform_1, window_bounds = array<i64: 16, 16>}, {pipeline_mode = #tpu.pipeline_mode<synchronous>, transform_indices = @transform_2, window_bounds = array<i64: 16, 16>}, {transform_indices = @transform_3, window_bounds = array<i64: 3, 16, 16>}, {transform_indices = @transform_4, window_bounds = array<i64: 3, 16, 16>}, {transform_indices = @transform_5, window_bounds = array<i64: 1, 8, 128>}]} {
    %c0 = arith.constant 0 : index
    %0 = memref.load %arg1[%c0] : memref<2xf32, #tpu.memory_space<smem>>
    %c1 = arith.constant 1 : index
    %1 = memref.load %arg1[%c1] : memref<2xf32, #tpu.memory_space<smem>>
    %c0_0 = arith.constant 0 : index
    %c0_1 = arith.constant 0 : index
    %2 = vector.load %arg2[%c0_0, %c0_1] : memref<16x16xf32, #tpu.memory_space<vmem>>, vector<16x16xf32>
    %c0_2 = arith.constant 0 : index
    %c0_3 = arith.constant 0 : index
    %3 = vector.load %arg3[%c0_2, %c0_3] : memref<16x16xf32, #tpu.memory_space<vmem>>, vector<16x16xf32>
    %c0_4 = arith.constant 0 : index
    %c0_5 = arith.constant 0 : index
    %c0_6 = arith.constant 0 : index
    %4 = vector.load %arg4[%c0_4, %c0_5, %c0_6] : memref<3x16x16xf32, #tpu.memory_space<vmem>>, vector<3x16x16xf32>
    %c0_7 = arith.constant 0 : index
    %c0_8 = arith.constant 0 : index
    %c0_9 = arith.constant 0 : index
    %5 = vector.load %arg5[%c0_7, %c0_8, %c0_9] : memref<3x16x16xf32, #tpu.memory_space<vmem>>, vector<3x16x16xf32>
    %6 = arith.mulf %4, %4 : vector<3x16x16xf32>
    %7 = arith.mulf %5, %5 : vector<3x16x16xf32>
    %8 = arith.mulf %4, %5 : vector<3x16x16xf32>
    %9 = tpu.concatenate %4, %5, %6, %7, %8 in 0 : vector<3x16x16xf32>, vector<3x16x16xf32>, vector<3x16x16xf32>, vector<3x16x16xf32>, vector<3x16x16xf32> -> vector<15x16x16xf32>
    %10 = vector.shape_cast %9 : vector<15x16x16xf32> to vector<240x16xf32>
    %cst = arith.constant dense<0.000000e+00> : vector<240x16xf32>
    %11 = tpu.matmul %10, %2, %cst {dimension_numbers = #tpu.dot_dimension_numbers<[1], [0], [0], [1], [0, 0, 1, 1], [], []>, precision = #tpu.contract_precision<fp32>} : vector<240x16xf32>, vector<16x16xf32>, vector<240x16xf32> -> vector<240x16xf32>
    %12 = vector.shape_cast %11 : vector<240x16xf32> to vector<15x16x16xf32>
    %13 = vector.extract_strided_slice %12 {offsets = [0, 0, 0], sizes = [1, 16, 16], strides = [1, 1, 1]} : vector<15x16x16xf32> to vector<1x16x16xf32>
    %14 = vector.shape_cast %13 : vector<1x16x16xf32> to vector<16x16xf32>
    %15 = vector.extract_strided_slice %12 {offsets = [1, 0, 0], sizes = [1, 16, 16], strides = [1, 1, 1]} : vector<15x16x16xf32> to vector<1x16x16xf32>
    %16 = vector.shape_cast %15 : vector<1x16x16xf32> to vector<16x16xf32>
    %17 = vector.extract_strided_slice %12 {offsets = [2, 0, 0], sizes = [1, 16, 16], strides = [1, 1, 1]} : vector<15x16x16xf32> to vector<1x16x16xf32>
    %18 = vector.shape_cast %17 : vector<1x16x16xf32> to vector<16x16xf32>
    %19 = vector.extract_strided_slice %12 {offsets = [3, 0, 0], sizes = [1, 16, 16], strides = [1, 1, 1]} : vector<15x16x16xf32> to vector<1x16x16xf32>
    %20 = vector.shape_cast %19 : vector<1x16x16xf32> to vector<16x16xf32>
    %21 = vector.extract_strided_slice %12 {offsets = [4, 0, 0], sizes = [1, 16, 16], strides = [1, 1, 1]} : vector<15x16x16xf32> to vector<1x16x16xf32>
    %22 = vector.shape_cast %21 : vector<1x16x16xf32> to vector<16x16xf32>
    %23 = vector.extract_strided_slice %12 {offsets = [5, 0, 0], sizes = [1, 16, 16], strides = [1, 1, 1]} : vector<15x16x16xf32> to vector<1x16x16xf32>
    %24 = vector.shape_cast %23 : vector<1x16x16xf32> to vector<16x16xf32>
    %25 = vector.extract_strided_slice %12 {offsets = [6, 0, 0], sizes = [1, 16, 16], strides = [1, 1, 1]} : vector<15x16x16xf32> to vector<1x16x16xf32>
    %26 = vector.shape_cast %25 : vector<1x16x16xf32> to vector<16x16xf32>
    %27 = vector.extract_strided_slice %12 {offsets = [7, 0, 0], sizes = [1, 16, 16], strides = [1, 1, 1]} : vector<15x16x16xf32> to vector<1x16x16xf32>
    %28 = vector.shape_cast %27 : vector<1x16x16xf32> to vector<16x16xf32>
    %29 = vector.extract_strided_slice %12 {offsets = [8, 0, 0], sizes = [1, 16, 16], strides = [1, 1, 1]} : vector<15x16x16xf32> to vector<1x16x16xf32>
    %30 = vector.shape_cast %29 : vector<1x16x16xf32> to vector<16x16xf32>
    %31 = vector.extract_strided_slice %12 {offsets = [9, 0, 0], sizes = [1, 16, 16], strides = [1, 1, 1]} : vector<15x16x16xf32> to vector<1x16x16xf32>
    %32 = vector.shape_cast %31 : vector<1x16x16xf32> to vector<16x16xf32>
    %33 = vector.extract_strided_slice %12 {offsets = [10, 0, 0], sizes = [1, 16, 16], strides = [1, 1, 1]} : vector<15x16x16xf32> to vector<1x16x16xf32>
    %34 = vector.shape_cast %33 : vector<1x16x16xf32> to vector<16x16xf32>
    %35 = vector.extract_strided_slice %12 {offsets = [11, 0, 0], sizes = [1, 16, 16], strides = [1, 1, 1]} : vector<15x16x16xf32> to vector<1x16x16xf32>
    %36 = vector.shape_cast %35 : vector<1x16x16xf32> to vector<16x16xf32>
    %37 = vector.extract_strided_slice %12 {offsets = [12, 0, 0], sizes = [1, 16, 16], strides = [1, 1, 1]} : vector<15x16x16xf32> to vector<1x16x16xf32>
    %38 = vector.shape_cast %37 : vector<1x16x16xf32> to vector<16x16xf32>
    %39 = vector.extract_strided_slice %12 {offsets = [13, 0, 0], sizes = [1, 16, 16], strides = [1, 1, 1]} : vector<15x16x16xf32> to vector<1x16x16xf32>
    %40 = vector.shape_cast %39 : vector<1x16x16xf32> to vector<16x16xf32>
    %41 = vector.extract_strided_slice %12 {offsets = [14, 0, 0], sizes = [1, 16, 16], strides = [1, 1, 1]} : vector<15x16x16xf32> to vector<1x16x16xf32>
    %42 = vector.shape_cast %41 : vector<1x16x16xf32> to vector<16x16xf32>
    %43 = tpu.concatenate %14, %16, %18, %20, %22, %24, %26, %28, %30, %32, %34, %36, %38, %40, %42 in 1 : vector<16x16xf32>, vector<16x16xf32>, vector<16x16xf32>, vector<16x16xf32>, vector<16x16xf32>, vector<16x16xf32>, vector<16x16xf32>, vector<16x16xf32>, vector<16x16xf32>, vector<16x16xf32>, vector<16x16xf32>, vector<16x16xf32>, vector<16x16xf32>, vector<16x16xf32>, vector<16x16xf32> -> vector<16x240xf32>
    %cst_10 = arith.constant dense<0.000000e+00> : vector<16x240xf32>
    %44 = tpu.matmul %3, %43, %cst_10 {dimension_numbers = #tpu.dot_dimension_numbers<[1], [0], [0], [1], [0, 0, 1, 1], [], []>, precision = #tpu.contract_precision<fp32>} : vector<16x16xf32>, vector<16x240xf32>, vector<16x240xf32> -> vector<16x240xf32>
    %45 = vector.extract_strided_slice %44 {offsets = [0, 0], sizes = [16, 48], strides = [1, 1]} : vector<16x240xf32> to vector<16x48xf32>
    %46 = vector.extract_strided_slice %44 {offsets = [0, 48], sizes = [16, 48], strides = [1, 1]} : vector<16x240xf32> to vector<16x48xf32>
    %47 = vector.extract_strided_slice %44 {offsets = [0, 96], sizes = [16, 48], strides = [1, 1]} : vector<16x240xf32> to vector<16x48xf32>
    %48 = vector.extract_strided_slice %44 {offsets = [0, 144], sizes = [16, 48], strides = [1, 1]} : vector<16x240xf32> to vector<16x48xf32>
    %49 = vector.extract_strided_slice %44 {offsets = [0, 192], sizes = [16, 48], strides = [1, 1]} : vector<16x240xf32> to vector<16x48xf32>
    %50 = arith.mulf %45, %45 : vector<16x48xf32>
    %51 = arith.mulf %46, %46 : vector<16x48xf32>
    %52 = arith.mulf %45, %46 : vector<16x48xf32>
    %53 = arith.subf %47, %50 : vector<16x48xf32>
    %54 = arith.subf %48, %51 : vector<16x48xf32>
    %55 = arith.subf %49, %52 : vector<16x48xf32>
    %cst_11 = arith.constant 2.000000e+00 : f32
    %56 = vector.broadcast %cst_11 : f32 to vector<16x48xf32>
    %57 = arith.mulf %56, %55 : vector<16x48xf32>
    %58 = vector.broadcast %1 : f32 to vector<16x48xf32>
    %59 = arith.addf %57, %58 : vector<16x48xf32>
    %60 = arith.addf %53, %54 : vector<16x48xf32>
    %61 = vector.broadcast %1 : f32 to vector<16x48xf32>
    %62 = arith.addf %60, %61 : vector<16x48xf32>
    %cst_12 = arith.constant 2.000000e+00 : f32
    %63 = vector.broadcast %cst_12 : f32 to vector<16x48xf32>
    %64 = arith.mulf %63, %52 : vector<16x48xf32>
    %65 = vector.broadcast %0 : f32 to vector<16x48xf32>
    %66 = arith.addf %64, %65 : vector<16x48xf32>
    %67 = arith.mulf %66, %59 : vector<16x48xf32>
    %68 = arith.addf %50, %51 : vector<16x48xf32>
    %69 = vector.broadcast %0 : f32 to vector<16x48xf32>
    %70 = arith.addf %68, %69 : vector<16x48xf32>
    %71 = arith.mulf %70, %62 : vector<16x48xf32>
    %72 = tpu.reciprocal %71 : vector<16x48xf32> -> vector<16x48xf32>
    %73 = arith.mulf %67, %72 : vector<16x48xf32>
    %74 = tpu.iota {dimensions = array<i32: 0>} : vector<16x16xi32>
    %75 = tpu.iota {dimensions = array<i32: 1>} : vector<16x16xi32>
    %c6_i32 = arith.constant 6 : i32
    %76 = vector.broadcast %c6_i32 : i32 to vector<16x16xi32>
    %77 = arith.cmpi slt, %74, %76 : vector<16x16xi32>
    %c6_i32_13 = arith.constant 6 : i32
    %78 = vector.broadcast %c6_i32_13 : i32 to vector<16x16xi32>
    %79 = arith.cmpi slt, %75, %78 : vector<16x16xi32>
    %80 = arith.andi %77, %79 : vector<16x16xi1>
    %81 = arith.extui %80 : vector<16x16xi1> to vector<16x16xi32>
    %82 = arith.sitofp %81 : vector<16x16xi32> to vector<16x16xf32>
    %83 = tpu.concatenate %82, %82, %82 in 1 : vector<16x16xf32>, vector<16x16xf32>, vector<16x16xf32> -> vector<16x48xf32>
    %84 = arith.mulf %73, %83 : vector<16x48xf32>
    %85 = vector.shape_cast %84 : vector<16x48xf32> to vector<1x16x48xf32>
    %cst_14 = arith.constant dense<0.000000e+00> : vector<1xf32>
    %86 = vector.multi_reduction <add>, %85, %cst_14 [1, 2] : vector<1x16x48xf32> to vector<1xf32>
    %87 = vector.shape_cast %86 : vector<1xf32> to vector<1x1x1xf32>
    %88 = vector.extract %87[0, 0, 0] : f32 from vector<1x1x1xf32>
    %89 = vector.broadcast %88 : f32 to vector<8x128xf32>
    %c0_15 = arith.constant 0 : index
    %c0_16 = arith.constant 0 : index
    %c0_17 = arith.constant 0 : index
    %90 = vector.load %arg6[%c0_15, %c0_16, %c0_17] : memref<1x8x128xf32, #tpu.memory_space<vmem>>, vector<1x8x128xf32>
    %91 = vector.shape_cast %90 : vector<1x8x128xf32> to vector<8x128xf32>
    %92 = vector.shape_cast %89 : vector<8x128xf32> to vector<1x8x128xf32>
    tpu.vector_store %arg6[%c0_15, %c0_16, %c0_17], %92 {strides = array<i32>} : memref<1x8x128xf32, #tpu.memory_space<vmem>>, vector<1x8x128xf32>,
    return
  }
  func.func @transform_0(%arg0: i32) -> i32 {
    %c0_i32 = arith.constant 0 : i32
    %c0_i32_0 = arith.constant 0 : i32
    return %c0_i32 : i32
  }
  func.func @transform_1(%arg0: i32) -> (i32, i32) {
    %c0_i32 = arith.constant 0 : i32
    %c0_i32_0 = arith.constant 0 : i32
    %c0_i32_1 = arith.constant 0 : i32
    return %c0_i32, %c0_i32_0 : i32, i32
  }
  func.func @transform_2(%arg0: i32) -> (i32, i32) {
    %c0_i32 = arith.constant 0 : i32
    %c0_i32_0 = arith.constant 0 : i32
    %c0_i32_1 = arith.constant 0 : i32
    return %c0_i32, %c0_i32_0 : i32, i32
  }
  func.func @transform_3(%arg0: i32) -> (i32, i32, i32) {
    %c0_i32 = arith.constant 0 : i32
    %c0_i32_0 = arith.constant 0 : i32
    %c0_i32_1 = arith.constant 0 : i32
    return %arg0, %c0_i32, %c0_i32_0 : i32, i32, i32
  }
  func.func @transform_4(%arg0: i32) -> (i32, i32, i32) {
    %c0_i32 = arith.constant 0 : i32
    %c0_i32_0 = arith.constant 0 : i32
    %c0_i32_1 = arith.constant 0 : i32
    return %arg0, %c0_i32, %c0_i32_0 : i32, i32, i32
  }
  func.func @transform_5(%arg0: i32) -> (i32, i32, i32) {
    %c0_i32 = arith.constant 0 : i32
    %c0_i32_0 = arith.constant 0 : i32
    %c0_i32_1 = arith.constant 0 : i32
    return %arg0, %c0_i32, %c0_i32_0 : i32, i32, i32
  }
}

</mosaic_0001>

<bundles_post_ra>
// kernel: tpu_custom_call.1
= control target key start
LH: loop header
LB: loop body
LE: loop exit
PB: predicated region body
PF: predicated region fallthrough
CT: control target
= control target key end

     0   :  { %s5299_s0 = inlined_call_operand.hbm [shape: f32[2], index: 0, kind: input, shape index: {}]   ;;  %s5300_s1 = inlined_call_operand.hbm [shape: f32[16,16], index: 1, kind: input, shape index: {}]   ;;  %s5301_s2 = inlined_call_operand.hbm [shape: f32[16,16], index: 2, kind: input, shape index: {}]   ;;  %s5302_s3 = inlined_call_operand.hbm [shape: f32[6,16,16], index: 3, kind: input, shape index: {}]   ;;  %s5303_s4 = inlined_call_operand.hbm [shape: f32[6,16,16], index: 4, kind: input, shape index: {}]   ;;  %s5304_s5 = inlined_call_operand.hbm [shape: f32[2,8,128], index: 5, kind: output, shape index: {}]  }
   0x1   :  { %5358 = sst [smem:[#allocation27_spill]] %s5300_s1 }
   0x2   :  { %5359 = sst [smem:[#allocation28_spill]] %s5302_s3 }
   0x3   :  { %10 = vsyncpa [#allocation5], 0 }
   0x4   :  { %11 = vsyncpa [#allocation3], 0 }
   0x5   :  { %12 = vsyncpa [#allocation8], 0 }
   0x6   :  { %13 = vsyncpa [#allocation4], 0 }
   0x7   :  { %15 = vsyncpa [#allocation4 + $0x1], 0  ;;  %s4222_s18 = smov 0   ;;  %s4224_s19 = smov 0  }
   0x8   :  { %s4226_s20 = smov 0   ;;  %s4228_s21 = smov 0  }
   0x9 LB: > { %5360 = sst [smem:[#allocation17_spill]] %s4170_s20  ;;  %s4243_s22 = sadd.s32 4294967295, %s4174_s21   ;;  %s4174_s21 = sphi %s4228_s21, %s5436_s21   ;;  %s4170_s20 = sphi %s4226_s20, %s5438_s20   ;;  %s4166_s19 = sphi %s4224_s19, %s5440_s19   ;;  %s4162_s18 = sphi %s4222_s18, %s5439_s18  }
   0xa   : > { %s3123_s23 = sadd.s32 4294967294, %s4174_s21   ;;  %s4247_s24 = sadd.s32 1, %s4174_s21  }
   0xb   : > { %5361 = sst [smem:[#allocation18_spill]] %s4247_s24  ;;  %s91_s25 = sadd.s32 1, %s4170_s20 }
   0xc   : > { %s88_s26 = ssub.s32 %s4174_s21, %s4247_s24  ;;  %p98_p0 = scmp.ne.s32.totalorder %s4170_s20, %s4166_s19 }
   0xd   : > { %p89_p1 = scmp.eq.s32.totalorder %s88_s26, 0  ;;  %p99_p2 = scmp.eq.s32.totalorder %s4174_s21, 0 }
   0xe   : > { %p104_p3 = scmp.ne.s32.totalorder %s4166_s19, %s4162_s18  ;;  %p5305_p4 = scmp.eq.s32.totalorder %s4243_s22, 0 }
   0xf   : > { %s4259_s27 = scalar_select %p89_p1, %s4170_s20, %s91_s25  }
  0x10   : > { %p4261_p5 = por %p99_p2, %p98_p0  ;;  %p4267_p6 = por %p5305_p4, %p104_p3 }
  0x11   : > { %5362 = sst [smem:[#allocation19_spill]] %s4259_s27  ;;  %p154_p7 = scmp.eq.s32.totalorder %s4243_s22, 1 }
  0x12   : > { %s5363_s28 = scalar_select %p4261_p5, 1, 0 }
  0x13   : > { %s5364_s29 = scalar_select %p4267_p6, 1, 0 }
  0x14   : > { %p160_p8 = scmp.eq.s32.totalorder %s3123_s23, 1  ;;  %p3124_p9 = scmp.ge.s32.totalorder %s4174_s21, 1 }
  0x15   : > { %p167_p10 = scmp.lt.s32.totalorder %s4174_s21, 3  ;;  %p4274_p11 = por %p154_p7, %p98_p0 }
  0x16   : > { %p4278_p12 = por %p160_p8, %p104_p3  ;;  %s4176_s8 = smov [#allocation6]  }
  0x17   : > { %s5365_s30 = scalar_select %p4274_p11, 1, 0 }
  0x18   : > { %s5366_s6 = scalar_select %p4278_p12, 1, 0 }
  0x19   : > { %p4282_p13 = pnand %p3124_p9, %p167_p10  ;;  %s188_s9 = sshll.u32 %s4176_s8, 4  ;;  %s189_s9 = int_to_ptr.vmem [resolvable:$true] %s188_s9 }
  0x1a   : > { %s5369_s1 = sld [smem:[#allocation27_spill]] }
  0x1b   : > { %s5367_s7 = scalar_select %p4282_p13, 1, 0 }
  0x1c   : > { %p3879_p1 = pneg %p4282_p13 }
  0x1e   : > { %p4290_p2 = pnand %p3879_p1, %p5305_p4 }
  0x20   : > { %s5368_s10 = scalar_select %p4290_p2, 1, 0 }
  0x21   : > { %s3967_s14 = scalar_lea.hbm %s5369_s1, 256  ;;  %p4305_p8 = pneg %p4290_p2 }
  0x22   : > { %p3968_p7 = scmp.ne.s32.totalorder %s5369_s1, %s3967_s14  ;;  %p3974_p1 = scmp.lt.u32.totalorder %s3967_s14, %s5369_s1 }
  0x24   : > { %p3970_p9 = pnand %p4305_p8, %p3968_p7 }
  0x26   : > { %p3971_p10 = pneg %p3970_p9 }
  0x28   : > { %p3976_p0 = pnand %p3974_p1, %p3971_p10 }
  0x2a   : > { %3979 = shalt.err (!%p3976_p0)
}
  0x2b   : > { %s3980_s26 = scalar_lea.vmem %s189_s9, 256  ;;  %p3988_p11 = scmp.lt.s32.totalorder %s189_s9, %s189_s9 }
  0x2c   : > { %p3981_p4 = scmp.ne.s32.totalorder %s189_s9, %s3980_s26  ;;  %p3989_p6 = scmp.lt.s32.totalorder %s3980_s26, %s3980_s26 }
  0x2e   : > { %p3983_p3 = pnand %p3981_p4, %p4305_p8  ;;  %p3990_p13 = por %p3989_p6, %p3988_p11 }
  0x30   : > { %p3984_p12 = pneg %p3983_p3 }
  0x32   : > { %p3991_p5 = pnand %p3990_p13, %p3984_p12 }
  0x34   : > { %3994 = shalt.err (!%p3991_p5)
}
  0x35   : > { %s5309_s8 = smov 128   ;;  %s5311_s12 = smov 8  }
  0x36   : > { %3885 = dma.hbm_to_vmem [thread:$0]  (!%p4290_p2), %s5369_s1, 256, %s189_s9, [#allocation3], %s5309_s8, %s5309_s8, %s5311_s12  }
  0x37   : > { %p5371_p4 = scmp.ne.s32.totalorder %s5363_s28, 0  ;;  %p5372_p6 = scmp.lt.s32.totalorder %s4174_s21, 2 }
  0x38   : > { %s217_s16 = sand.u32 1, %s4170_s20   ;;  %s5313_s25 = smul.u32 768, %s4174_s21 }
  0x39   : > { %p4328_p5 = pnand %p5372_p6, %p5371_p4  ;;  %s4333_s23 = smul.u32 48, %s217_s16 }
  0x3a   : > { %s5374_s3 = sld [smem:[#allocation28_spill]]  ;;  %s4179_s13 = smov [#allocation7]  }
  0x3b   : > { %s5373_s15 = scalar_select %p4328_p5, 1, 0 }
  0x3c   : > { %s219_s28 = scalar_lea.vmem [#allocation9], %s4333_s23  ;;  %s4346_s14 = sshll.u32 %s4179_s13, 4  ;;  %s202_s14 = int_to_ptr.vmem [resolvable:$true] %s4346_s14 }
  0x3d   : > { %s227_s9 = sshll.u32 %s219_s28, 4  ;;  %s5375_s16 = sand.u32 1, %s4174_s21   ;;  %s4344_s9 = int_to_ptr.vmem [resolvable:$true] %s227_s9 }
  0x3e   : > { %s4350_s8 = scalar_lea.sflag [#allocation3], %s5375_s16  ;;  %p5319_p12 = pneg %p4328_p5 }
  0x40   : > { %s4341_s27 = scalar_lea.hbm %s5374_s3, %s5313_s25  ;;  %s4000_s28 = scalar_lea.hbm %s5374_s3, 1536 }
  0x41   : > { %s3995_s12 = scalar_lea.hbm %s4341_s27, 768  ;;  %p4001_p3 = scmp.lt.u32.totalorder %s4341_s27, %s5374_s3 }
  0x42   : > { %p3996_p11 = scmp.ne.s32.totalorder %s4341_s27, %s3995_s12  ;;  %p4002_p7 = scmp.lt.u32.totalorder %s4000_s28, %s3995_s12 }
  0x43   : > { %p4004_p10 = scmp.lt.u32.totalorder %s3995_s12, %s4341_s27 }
  0x44   : > { %p3998_p13 = pnand %p5319_p12, %p3996_p11  ;;  %p4003_p9 = por %p4002_p7, %p4001_p3 }
  0x46   : > { %p3999_p0 = pneg %p3998_p13  ;;  %p4005_p1 = por %p4004_p10, %p4003_p9 }
  0x48   : > { %p4006_p4 = pnand %p4005_p1, %p3999_p0 }
  0x4a   : > { %4009 = shalt.err (!%p4006_p4)
}
  0x4b   : > { %s4010_s13 = scalar_lea.vmem %s4344_s9, 768  ;;  %s4180_s16 = smov [#allocation9]  }
  0x4c   : > { %p4011_p6 = scmp.ne.s32.totalorder %s4344_s9, %s4010_s13  ;;  %s4015_s11 = sshll.u32 %s4180_s16, 4  ;;  %s4016_s11 = int_to_ptr.vmem [resolvable:$false] %s4015_s11 }
  0x4d   : > { %s4017_s1 = scalar_lea.vmem %s4016_s11, 1536  ;;  %p4018_p2 = scmp.lt.s32.totalorder %s4344_s9, %s4016_s11 }
  0x4e   : > { %p4013_p11 = pnand %p4011_p6, %p5319_p12  ;;  %p4019_p3 = scmp.lt.s32.totalorder %s4017_s1, %s4010_s13 }
  0x50   : > { %p4014_p13 = pneg %p4013_p11  ;;  %p4020_p7 = por %p4019_p3, %p4018_p2 }
  0x52   : > { %p4021_p9 = pnand %p4020_p7, %p4014_p13 }
  0x54   : > { %4024 = shalt.err (!%p4021_p9)
}
  0x55   : > { %s5376_s12 = smov 8   ;;  %s5377_s25 = smov 128  }
  0x56   : > { %3892 = dma.hbm_to_vmem [thread:$0]  (!%p4328_p5), %s4341_s27, 768, %s4344_s9, %s4350_s8, %s5377_s25, %s5377_s25, %s5376_s12  }
  0x57   : > { %s4025_s16 = scalar_lea.hbm %s5299_s0, 16 }
  0x58   : > { %p4026_p2 = scmp.ne.s32.totalorder %s5299_s0, %s4025_s16  ;;  %p4032_p1 = scmp.lt.u32.totalorder %s4025_s16, %s5299_s0 }
  0x5a   : > { %p4028_p0 = pnand %p4026_p2, %p4305_p8 }
  0x5c   : > { %p4029_p10 = pneg %p4028_p0 }
  0x5e   : > { %p4034_p4 = pnand %p4032_p1, %p4029_p10 }
  0x60   : > { %4037 = shalt.err (!%p4034_p4)
}
  0x61   : > { %s4181_s20 = smov [#allocation2]   ;;  %p5378_p6 = scmp.ne.s32.totalorder %s5368_s10, 0 }
  0x62   : > { %s4038_s28 = scalar_lea.hbm %s5301_s2, 256 }
  0x63   : > { %3882 = dma.hbm_to_smem (!%p5378_p6), %s5299_s0, 16, %s4181_s20, [#allocation5]  }
  0x64   : > { %p4039_p11 = scmp.ne.s32.totalorder %s5301_s2, %s4038_s28  ;;  %p4045_p7 = scmp.lt.u32.totalorder %s4038_s28, %s5301_s2 }
  0x66   : > { %p4041_p13 = pnand %p4039_p11, %p4305_p8 }
  0x68   : > { %p4042_p3 = pneg %p4041_p13 }
  0x6a   : > { %p4047_p9 = pnand %p4045_p7, %p4042_p3 }
  0x6c   : > { %4050 = shalt.err (!%p4047_p9)
}
  0x6d   : > { %s4051_s1 = scalar_lea.vmem %s202_s14, 256  ;;  %p4059_p1 = scmp.lt.s32.totalorder %s202_s14, %s202_s14 }
  0x6e   : > { %p4052_p2 = scmp.ne.s32.totalorder %s202_s14, %s4051_s1  ;;  %p4060_p4 = scmp.lt.s32.totalorder %s4051_s1, %s4051_s1 }
  0x70   : > { %p4054_p0 = pnand %p4052_p2, %p4305_p8  ;;  %p4061_p12 = por %p4060_p4, %p4059_p1 }
  0x72   : > { %p4055_p10 = pneg %p4054_p0 }
  0x74   : > { %p4062_p5 = pnand %p4061_p12, %p4055_p10 }
  0x76   : > { %4065 = shalt.err (!%p4062_p5)
}
  0x77   : > { %3888 = dma.hbm_to_vmem [thread:$0]  (!%p5378_p6), %s5301_s2, 256, %s202_s14, [#allocation8], %s5377_s25, %s5377_s25, %s5376_s12  }
  0x78   : > { %s5379_s17 = smul.u32 768, %s4174_s21  ;;  %s241_s10 = scalar_lea.vmem [#allocation10], %s4333_s23 }
  0x79   : > { %s249_s26 = sshll.u32 %s241_s10, 4  ;;  %p5380_p5 = scmp.ne.s32.totalorder %s5373_s15, 0  ;;  %s4427_s26 = int_to_ptr.vmem [resolvable:$true] %s249_s26 }
  0x7a   : > { %s4424_s3 = scalar_lea.hbm %s5303_s4, %s5379_s17  ;;  %s4071_s16 = scalar_lea.hbm %s5303_s4, 1536 }
  0x7b   : > { %s4066_s28 = scalar_lea.hbm %s4424_s3, 768  ;;  %p5381_p12 = pneg %p5380_p5 }
  0x7c   : > { %p4067_p8 = scmp.ne.s32.totalorder %s4424_s3, %s4066_s28  ;;  %p4072_p13 = scmp.lt.u32.totalorder %s4424_s3, %s5303_s4 }
  0x7d   : > { %p4073_p3 = scmp.lt.u32.totalorder %s4071_s16, %s4066_s28  ;;  %p4075_p9 = scmp.lt.u32.totalorder %s4066_s28, %s4424_s3 }
  0x7e   : > { %p4069_p11 = pnand %p4067_p8, %p5381_p12 }
  0x7f   : > { %p4074_p7 = por %p4073_p3, %p4072_p13 }
  0x80   : > { %p4070_p6 = pneg %p4069_p11 }
  0x81   : > { %p4076_p2 = por %p4075_p9, %p4074_p7 }
  0x83   : > { %p4077_p0 = pnand %p4076_p2, %p4070_p6 }
  0x85   : > { %4080 = shalt.err (!%p4077_p0)
}
  0x86   : > { %s4081_s23 = scalar_lea.vmem %s4427_s26, 768  ;;  %p5382_p1 = pmov %p5381_p12 }
  0x87   : > { %p4082_p10 = scmp.ne.s32.totalorder %s4427_s26, %s4081_s23  ;;  %s4182_s20 = smov [#allocation10]  }
  0x88   : > { %s4086_s24 = sshll.u32 %s4182_s20, 4  ;;  %s4087_s24 = int_to_ptr.vmem [resolvable:$false] %s4086_s24 }
  0x89   : > { %p4084_p4 = pnand %p4082_p10, %p5382_p1  ;;  %s4088_s17 = scalar_lea.vmem %s4087_s24, 1536 }
  0x8a   : > { %p4089_p12 = scmp.lt.s32.totalorder %s4427_s26, %s4087_s24  ;;  %p4090_p11 = scmp.lt.s32.totalorder %s4088_s17, %s4081_s23 }
  0x8b   : > { %p4085_p8 = pneg %p4084_p4 }
  0x8c   : > { %p4091_p13 = por %p4090_p11, %p4089_p12 }
  0x8e   : > { %p4092_p3 = pnand %p4091_p13, %p4085_p8 }
  0x90   : > { %4095 = shalt.err (!%p4092_p3)
}
  0x91   : > { %3895 = dma.hbm_to_vmem [thread:$0]  (!%p5380_p5), %s4424_s3, 768, %s4427_s26, %s4350_s8, %s5377_s25, %s5377_s25, %s5376_s12  }
  0x92   : > { %p5383_p6 = scmp.ne.s32.totalorder %s5367_s7, 0 }
  0x94   : > { %261 = sbr.rel (%p5383_p6) target bundleno = 1580 (0x62c), region = 40 }
  0x9b   : > { %p5384_p7 = scmp.eq.s32.totalorder %s4243_s22, 0 }
  0x9d   : > { %4141 = dma.done.wait (%p5384_p7), [#allocation5], 16   ;;  %p5385_p9 = pmov %p5384_p7 }
  0x9e   : > { %p5386_p2 = pmov %p5384_p7 }
  0x9f   : > { %4143 = vsyncadd (%p5385_p9), [#allocation5], 4294967280 }
  0xa0   : > { %4145 = dma.done.wait (%p5386_p2), [#allocation3], 256   ;;  %p5387_p0 = pmov %p5386_p2 }
  0xa2   : > { %4147 = vsyncadd (%p5387_p0), [#allocation3], 4294967040  ;;  %p5388_p10 = pmov %p5387_p0 }
  0xa3   : > { %p5389_p5 = pmov %p5387_p0 }
  0xa4   : > { %4149 = dma.done.wait (%p5388_p10), [#allocation8], 256  }
  0xa5   : > { %4151 = vsyncadd (%p5389_p5), [#allocation8], 4294967040  ;;  %s275_s7 = sand.u32 1, %s4243_s22   ;;  %s4472_s8 = sand.u32 1, %s4166_s19  }
  0xa6   : > { %s3858_s15 = smul.u32 48, %s4472_s8  ;;  %s276_s12 = scalar_lea.sflag [#allocation3], %s275_s7 }
  0xa7   : > { %p5390_p1 = scmp.ne.s32.totalorder %s5364_s29, 0 }
  0xa8   : > { %s279_s25 = scalar_lea.vmem [#allocation9], %s3858_s15 }
  0xa9   : > { %4153 = dma.done.wait (%p5390_p1), %s276_s12, 1536  }
  0xaa   : > { %4155 = vsyncadd (%p5390_p1), %s276_s12, 4294965760  ;;  %s4479_s27 = scalar_lea.vmem [#allocation10], %s3858_s15 }
  0xab   : > { %293 = sfence }
  0xac   : > { %v325_v0 = vld [vmem:[#allocation6] sm:$0xff]  ;;  %v326_v1 = vld [vmem:[#allocation6 + $0x8] sm:$0xff]  ;;  %vm359_vm0 = vcmask 130048   ;;  %s4183_s29 = smov 16   ;;  %s4184_s9 = smov 32   ;;  %vm2262_vm1 = vcmask 261120  }
  0xad   : > { %v4481_v2 = vld [vmem:[%s279_s25] sm:$0xff]  ;;  %v451_v3 = vand.u32 4294901760, %v325_v0  ;;  %v454_v4 = vand.u32 4294901760, %v326_v1  ;;  %v4485_v6 = vld [vmem:[%s279_s25 + $0x8] sm:$0xff]  ;;  %v4487_v7 = vld [vmem:[%s279_s25 + $0x10] sm:$0xff]  ;;  %s4185_s3 = smov 48  }
  0xae   : > { %v361_v5 = vsel %vm359_vm0, %v4481_v2, 0  ;;  %v4489_v8 = vld [vmem:[%s279_s25 + $0x18] sm:$0xff]  ;;  %v364_v10 = vsel %vm359_vm0, %v4485_v6, 0  ;;  %v4503_v15 = vld [vmem:[%s279_s25 + $0x20] sm:$0xff]  ;;  %v367_v17 = vsel %vm359_vm0, %v4487_v7, 0  ;;  %v4524_v23 = vld [vmem:[%s279_s25 + $0x28] sm:$0xff]  ;;  %v4529_v24 = vmul.f32 %v4481_v2, %v4481_v2 }
  0xaf   : > { %v4491_v9 = vand.u32 4294901760, %v361_v5  ;;  %v4495_v11 = vpack.c.bf16 %v454_v4, %v451_v3  ;;  %v4497_v12 = vsub.f32 %v325_v0, %v451_v3  ;;  %v4499_v13 = vsub.f32 %v326_v1, %v454_v4  ;;  %v335_v32 = vld [vmem:[%s4479_s27] sm:$0xff]  ;;  %v336_v41 = vld [vmem:[%s4479_s27 + $0x8] sm:$0xff]  ;;  %v337_v54 = vld [vmem:[%s4479_s27 + $0x10] sm:$0xff]  ;;  %s4186_s10 = smov 64   ;;  %s4187_s26 = smov 80  }
  0xb0   : > { %v4501_v14 = vand.u32 4294901760, %v364_v10  ;;  %v370_v18 = vsel %vm359_vm0, %v4489_v8, 0  ;;  %v4520_v21 = vand.u32 4294901760, %v367_v17  ;;  %v4534_v25 = vmul.f32 %v4485_v6, %v4485_v6  ;;  %v4617_v63 = vld [vmem:[%s4479_s27 + $0x18] sm:$0xff]  ;;  %s4188_s28 = smov 96   ;;  %s4190_s14 = smov 112  }
  0xb1   : > { %v4506_v16 = vsub.f32 %v361_v5, %v4491_v9  ;;  %v4514_v19 = vpack.c.bf16 %v4499_v13, %v4497_v12  ;;  %3637 = vmatprep.subr.bf16.mxu1 %v4495_v11  ;;  %v4522_v22 = vand.u32 4294901760, %v370_v18  ;;  %v373_v27 = vsel %vm359_vm0, %v4503_v15, 0  ;;  %s3138_s11 = sld [smem:[#allocation2 + $0x1]]  ;;  %s323_s16 = sld [smem:[#allocation2]] }
  0xb2   : > { %v4518_v20 = vsub.f32 %v364_v10, %v4501_v14  ;;  %3639 = vmatpush3.bf16.msra.mxu1 %v4495_v11  ;;  %v4542_v29 = vsub.f32 %v367_v17, %v4520_v21  ;;  %v4547_v31 = vand.u32 4294901760, %v373_v27  ;;  %v4556_v34 = vmul.f32 %v4487_v7, %v4487_v7  ;;  %s3137_s13 = sshll.u32 %s4472_s8, 3  ;;  %s3141_s20 = sshll.u32 %s4243_s22, 7 }
  0xb3   : > { %3444 = vmatprep.mubr.f32.mxu0 %v4506_v16  ;;  %v5332_v26 = vand.u32 4294901760, %v4506_v16  ;;  %3645 = vmatprep.subr.bf16.mxu0 %v4514_v19  ;;  %v4545_v30 = vsub.f32 %v370_v18, %v4522_v22  ;;  %v4560_v35 = vmul.f32 %v4489_v8, %v4489_v8  ;;  %v376_v36 = vsel %vm359_vm0, %v4524_v23, 0  ;;  %v4637_v18 = vld [vmem:[%s4479_s27 + $0x20] sm:$0xff]  ;;  %s320_s1 = scalar_lea.vmem [#allocation11], %s3137_s13  ;;  %s5257_s15 = scalar_lea.hbm %s5304_s5, %s3141_s20 }
  0xb4   : > { %v5331_v28 = vand.u32 4294901760, %v4518_v20  ;;  %3647 = vmatpush3.bf16.msra.mxu0 %v4514_v19  ;;  %v5329_v38 = vand.u32 4294901760, %v4542_v29  ;;  %v4570_v40 = vsub.f32 %v373_v27, %v4547_v31  ;;  %v4576_v43 = vmul.f32 %v4503_v15, %v4503_v15  ;;  %s3002_s23 = sshll.u32 %s320_s1, 4  ;;  %s2989_s12 = scalar_lea.sflag [#allocation4], %s4472_s8  ;;  %s5252_s23 = int_to_ptr.vmem [resolvable:$true] %s3002_s23 }
  0xb5   : > { %v520_v33 = vsub.f32 %v4506_v16, %v5332_v26  ;;  %v5327_v39 = vand.u32 4294901760, %v4545_v30  ;;  %3649 = vmatprep.subr.bf16.mxu0 %v4495_v11  ;;  %v4578_v44 = vand.u32 4294901760, %v376_v36  ;;  %v379_v45 = vsel %vm359_vm0, %v335_v32, 0  ;;  %s4096_s25 = scalar_lea.vmem %s5252_s23, 128  ;;  %p5433_p8 = scmp.ne.s32.totalorder %s5365_s30, 0 }
  0xb6   : > { %v530_v37 = vsub.f32 %v4518_v20, %v5331_v28  ;;  %v540_v47 = vsub.f32 %v4542_v29, %v5329_v38  ;;  %v5326_v49 = vand.u32 4294901760, %v4570_v40  ;;  %v4592_v50 = vmul.f32 %v4524_v23, %v4524_v23  ;;  %p4097_p4 = scmp.ne.s32.totalorder %s5252_s23, %s4096_s25  ;;  %s4191_s22 = smov [#allocation11]  }
  0xb7   : > { %v521_v42 = vand.u32 4294901760, %v520_v33  ;;  %3445 = vmatmul.mubr.f32.vlgmr.msra.gmra.mrb[0].mxu0 %v4518_v20  ;;  %v550_v48 = vsub.f32 %v4545_v30, %v5327_v39  ;;  %v4595_v51 = vsub.f32 %v376_v36, %v4578_v44  ;;  %v4597_v52 = vand.u32 4294901760, %v379_v45 }
  0xb8   : > { %v531_v46 = vand.u32 4294901760, %v530_v37  ;;  %3447 = vmatprep.mubr.f32.mxu0 %v4542_v29  ;;  %v382_v53 = vsel %vm359_vm0, %v336_v41, 0  ;;  %v541_v55 = vand.u32 4294901760, %v540_v47  ;;  %v560_v57 = vsub.f32 %v4570_v40, %v5326_v49  ;;  %3651 = vmatpush3.bf16.msra.mxu0 %v4495_v11  ;;  %p4098_p12 = pnand %p4097_p4, %p5433_p8 }
  0xb9   : > { %3346 = vmatprep.mubr.f32.mxu1 %v521_v42  ;;  %v551_v56 = vand.u32 4294901760, %v550_v48  ;;  %v4604_v58 = vand.u32 4294901760, %v382_v53  ;;  %v5325_v59 = vand.u32 4294901760, %v4595_v51  ;;  %v4608_v60 = vmul.f32 %v335_v32, %v335_v32 }
  0xba   : > { %3347 = vmatmul.mubr.f32.vlgmr.msra.gmra.mrb[0].mxu1 %v531_v46  ;;  %v4611_v61 = vmul.f32 %v335_v32, %v4481_v2  ;;  %v4614_v62 = vsub.f32 %v379_v45, %v4597_v52  ;;  %v561_v0 = vand.u32 4294901760, %v560_v57  ;;  %v4620_v1 = vmul.f32 %v336_v41, %v336_v41  ;;  %v4656_v45 = vld [vmem:[%s4479_s27 + $0x28] sm:$0xff]  ;;  %p4099_p11 = pneg %p4098_p12  ;;  %s4100_s27 = sshll.u32 %s4191_s22, 4  ;;  %s4101_s27 = int_to_ptr.vmem [resolvable:$false] %s4100_s27 }
  0xbb   : > { %3448 = vmatmul.mubr.f32.gmra.mrb[2].mxu0 %v4545_v30  ;;  %3349 = vmatprep.mubr.f32.mxu1 %v541_v55  ;;  %v4623_v3 = vsub.f32 %v382_v53, %v4604_v58  ;;  %v385_v4 = vsel %vm359_vm0, %v337_v54, 0  ;;  %v570_v2 = vsub.f32 %v4595_v51, %v5325_v59  ;;  %v4631_v5 = vmul.f32 %v336_v41, %v4485_v6  ;;  %p4103_p13 = scmp.lt.s32.totalorder %s5252_s23, %s4101_s27 }
  0xbc   : > { %3450 = vmatprep.mubr.f32.mxu0 %v4570_v40  ;;  %v5324_v10 = vand.u32 4294901760, %v4614_v62  ;;  %v4634_v17 = vand.u32 4294901760, %v385_v4  ;;  %v4640_v32 = vmul.f32 %v337_v54, %v337_v54  ;;  %v4643_v33 = vmul.f32 %v337_v54, %v4487_v7 }
  0xbd   : > { %v5322_v27 = vand.u32 4294901760, %v4623_v3  ;;  %v388_v36 = vsel %vm359_vm0, %v4617_v63, 0  ;;  %v571_v6 = vand.u32 4294901760, %v570_v2  ;;  %v4664_v46 = vmul.f32 %v4617_v63, %v4617_v63 }
  0xbe   : > { %3350 = vmatmul.mubr.f32.gmra.mrb[2].mxu1 %v551_v56  ;;  %v580_v37 = vsub.f32 %v4614_v62, %v5324_v10  ;;  %v4651_v41 = vsub.f32 %v385_v4, %v4634_v17  ;;  %v4653_v42 = vand.u32 4294901760, %v388_v36  ;;  %v4668_v47 = vmul.f32 %v4637_v18, %v4637_v18 }
  0xbf   : > { %3352 = vmatprep.mubr.f32.mxu1 %v561_v0  ;;  %3451 = vmatmul.mubr.f32.gmra.mrb[4].mxu0 %v4595_v51  ;;  %v590_v7 = vsub.f32 %v4623_v3, %v5322_v27  ;;  %v391_v48 = vsel %vm359_vm0, %v4637_v18, 0  ;;  %v394_v0 = vsel %vm359_vm0, %v4656_v45, 0  ;;  %v397_v4 = vsel %vm359_vm0, %v4529_v24, 0 }
  0xc0   : > { %3453 = vmatprep.mubr.f32.mxu0 %v4614_v62  ;;  %v581_v53 = vand.u32 4294901760, %v580_v37  ;;  %v4674_v54 = vsub.f32 %v388_v36, %v4653_v42  ;;  %v5323_v55 = vand.u32 4294901760, %v4651_v41  ;;  %v4677_v56 = vand.u32 4294901760, %v391_v48 }
  0xc1   : > { %v591_v57 = vand.u32 4294901760, %v590_v7  ;;  %v400_v2 = vsel %vm359_vm0, %v4534_v25, 0  ;;  %v4695_v7 = vand.u32 4294901760, %v397_v4  ;;  %v403_v25 = vsel %vm359_vm0, %v4556_v34, 0 }
  0xc2   : > { %3353 = vmatmul.mubr.f32.gmra.mrb[4].mxu1 %v571_v6  ;;  %v600_v36 = vsub.f32 %v4651_v41, %v5323_v55  ;;  %v5328_v37 = vand.u32 4294901760, %v4674_v54  ;;  %v4690_v27 = vsub.f32 %v391_v48, %v4677_v56  ;;  %v4692_v6 = vand.u32 4294901760, %v394_v0 }
  0xc3   : > { %3355 = vmatprep.mubr.f32.mxu1 %v581_v53  ;;  %3454 = vmatmul.mubr.f32.gmra.mrb[6].mxu0 %v4623_v3  ;;  %5391 = vst [vmem:[#allocation20_spill] sm:$0xff] %v4695_v7  ;;  %v4697_v24 = vand.u32 4294901760, %v400_v2  ;;  %v406_v53 = vsel %vm359_vm0, %v4560_v35, 0  ;;  %v4712_v49 = vsub.f32 %v397_v4, %v4695_v7  ;;  %v4717_v35 = vand.u32 4294901760, %v403_v25 }
  0xc4   : > { %3456 = vmatprep.mubr.f32.mxu0 %v4651_v41  ;;  %v601_v55 = vand.u32 4294901760, %v600_v36  ;;  %v610_v48 = vsub.f32 %v4674_v54, %v5328_v37  ;;  %v4708_v10 = vsub.f32 %v394_v0, %v4692_v6  ;;  %v5330_v59 = vand.u32 4294901760, %v4690_v27 }
  0xc5   : > { %5392 = vst [vmem:[#allocation21_spill] sm:$0xff] %v4697_v24  ;;  %v4715_v34 = vsub.f32 %v400_v2, %v4697_v24  ;;  %5393 = vst [vmem:[#allocation22_spill] sm:$0xff] %v4717_v35  ;;  %v4719_v39 = vand.u32 4294901760, %v406_v53  ;;  %v5339_v4 = vand.u32 4294901760, %v4712_v49  ;;  %v4731_v38 = vsub.f32 %v403_v25, %v4717_v35 }
  0xc6   : > { %3356 = vmatmul.mubr.f32.gmra.mrb[6].mxu1 %v591_v57  ;;  %v611_v36 = vand.u32 4294901760, %v610_v48  ;;  %v620_v0 = vsub.f32 %v4690_v27, %v5330_v59  ;;  %v5333_v37 = vand.u32 4294901760, %v4708_v10  ;;  %v409_v57 = vsel %vm359_vm0, %v4576_v43, 0 }
  0xc7   : > { %5394 = vst [vmem:[#allocation23_spill] sm:$0xff] %v4719_v39  ;;  %3358 = vmatprep.mubr.f32.mxu1 %v601_v55  ;;  %3457 = vmatmul.mubr.f32.gmra.mrb[8].mxu0 %v4674_v54  ;;  %v5338_v2 = vand.u32 4294901760, %v4715_v34  ;;  %v4734_v55 = vsub.f32 %v406_v53, %v4719_v39  ;;  %v4740_v43 = vand.u32 4294901760, %v409_v57  ;;  %v412_v28 = vsel %vm359_vm0, %v4592_v50, 0 }
  0xc8   : > { %3459 = vmatprep.mubr.f32.mxu0 %v4690_v27  ;;  %v621_v48 = vand.u32 4294901760, %v620_v0  ;;  %v630_v59 = vsub.f32 %v4708_v10, %v5333_v37  ;;  %v640_v25 = vsub.f32 %v4712_v49, %v5339_v4  ;;  %v5344_v0 = vand.u32 4294901760, %v4731_v38 }
  0xc9   : > { %5395 = vst [vmem:[#allocation24_spill] sm:$0xff] %v4740_v43  ;;  %v650_v53 = vsub.f32 %v4715_v34, %v5338_v2  ;;  %v5347_v26 = vand.u32 4294901760, %v4734_v55  ;;  %v4753_v39 = vsub.f32 %v409_v57, %v4740_v43  ;;  %v4755_v35 = vand.u32 4294901760, %v412_v28 }
  0xca   : > { %3359 = vmatmul.mubr.f32.gmra.mrb[8].mxu1 %v611_v36  ;;  %v631_v37 = vand.u32 4294901760, %v630_v59  ;;  %v415_v50 = vsel %vm359_vm0, %v4608_v60, 0  ;;  %v352_v36 = vmul.f32 %v4656_v45, %v4656_v45  ;;  %v641_v2 = vand.u32 4294901760, %v640_v25 }
  0xcb   : > { %3361 = vmatprep.mubr.f32.mxu1 %v621_v48  ;;  %5396 = vst [vmem:[#allocation25_spill] sm:$0xff] %v4755_v35  ;;  %3460 = vmatmul.mubr.f32.gmra.mrb[10].mxu0 %v4708_v10  ;;  %v660_v4 = vsub.f32 %v4731_v38, %v5344_v0  ;;  %v670_v59 = vsub.f32 %v4734_v55, %v5347_v26  ;;  %v5397_v57 = vand.u32 4294901760, %v4506_v16  ;;  %v5350_v48 = vand.u32 4294901760, %v4753_v39 }
  0xcc   : > { %v4772_v60 = vsub.f32 %v412_v28, %v4755_v35  ;;  %v4774_v43 = vand.u32 4294901760, %v415_v50  ;;  %v418_v25 = vsel %vm359_vm0, %v4620_v1, 0  ;;  %v651_v24 = vand.u32 4294901760, %v650_v53 }
  0xcd   : > { %3493 = vmatprep.mubr.f32.mxu0 %v5397_v57  ;;  %v661_v0 = vand.u32 4294901760, %v660_v4  ;;  %v4778_v7 = vand.u32 4294901760, %v418_v25  ;;  %v421_v26 = vsel %vm359_vm0, %v4640_v32, 0  ;;  %v680_v16 = vsub.f32 %v4753_v39, %v5350_v48 }
  0xce   : > { %3362 = vmatmul.mubr.f32.gmra.mrb[10].mxu1 %v631_v37  ;;  %v5351_v28 = vand.u32 4294901760, %v4772_v60  ;;  %v4787_v57 = vsub.f32 %v415_v50, %v4774_v43  ;;  %v4789_v35 = vand.u32 4294901760, %v421_v26  ;;  %v5398_v1 = vand.u32 4294901760, %v4518_v20 }
  0xcf   : > { %3364 = vmatprep.mubr.f32.mxu1 %v641_v2  ;;  %v4794_v37 = vsub.f32 %v418_v25, %v4778_v7  ;;  %v424_v32 = vsel %vm359_vm0, %v4664_v46, 0  ;;  %v427_v4 = vsel %vm359_vm0, %v4668_v47, 0  ;;  %v430_v2 = vsel %vm359_vm0, %v352_v36, 0 }
  0xd0   : > { %3494 = vmatmul.mubr.f32.vlgmr.msra.gmra.mrb[0].mxu0 %v5398_v1  ;;  %v5399_v53 = vand.u32 4294901760, %v4542_v29  ;;  %v671_v50 = vand.u32 4294901760, %v670_v59  ;;  %v690_v20 = vsub.f32 %v4772_v60, %v5351_v28  ;;  %v5352_v1 = vand.u32 4294901760, %v4787_v57 }
  0xd1   : > { %v4808_v25 = vsub.f32 %v421_v26, %v4789_v35  ;;  %v4811_v48 = vand.u32 4294901760, %v424_v32  ;;  %v4813_v47 = vand.u32 4294901760, %v427_v4  ;;  %v4815_v36 = vand.u32 4294901760, %v430_v2 }
  0xd2   : > { %3496 = vmatprep.mubr.f32.mxu0 %v5399_v53  ;;  %3365 = vmatmul.mubr.f32.gmra.mrb[12].mxu1 %v651_v24  ;;  %v681_v29 = vand.u32 4294901760, %v680_v16  ;;  %v700_v59 = vsub.f32 %v4787_v57, %v5352_v1  ;;  %v433_v26 = vsel %vm359_vm0, %v4611_v61, 0  ;;  %v5400_v24 = vand.u32 4294901760, %v4545_v30 }
  0xd3   : > { %3367 = vmatprep.mubr.f32.mxu1 %v661_v0  ;;  %v4826_v28 = vsub.f32 %v424_v32, %v4811_v48  ;;  %v4829_v46 = vsub.f32 %v427_v4, %v4813_v47  ;;  %v4832_v0 = vsub.f32 %v430_v2, %v4815_v36  ;;  %v356_v16 = vmul.f32 %v4617_v63, %v4489_v8 }
  0xd4   : > { %3497 = vmatmul.mubr.f32.gmra.mrb[2].mxu0 %v5400_v24  ;;  %v5401_v1 = vand.u32 4294901760, %v4570_v40  ;;  %v691_v53 = vand.u32 4294901760, %v690_v20  ;;  %v4838_v61 = vand.u32 4294901760, %v433_v26  ;;  %v436_v30 = vsel %vm359_vm0, %v4631_v5, 0 }
  0xd5   : > { %v5402_v32 = vand.u32 4294901760, %v4794_v37  ;;  %v5403_v2 = vand.u32 4294901760, %v4808_v25  ;;  %v5353_v8 = vand.u32 4294901760, %v4826_v28  ;;  %v5354_v40 = vand.u32 4294901760, %v4829_v46 }
  0xd6   : > { %3499 = vmatprep.mubr.f32.mxu0 %v5401_v1  ;;  %3368 = vmatmul.mubr.f32.gmra.mrb[14].mxu1 %v671_v50  ;;  %v701_v63 = vand.u32 4294901760, %v700_v59  ;;  %v4851_v20 = vsub.f32 %v433_v26, %v4838_v61  ;;  %v4853_v1 = vand.u32 4294901760, %v436_v30  ;;  %v439_v5 = vsel %vm359_vm0, %v4643_v33, 0 }
  0xd7   : > { %v710_v4 = vsub.f32 %v4794_v37, %v5402_v32  ;;  %v720_v24 = vsub.f32 %v4808_v25, %v5403_v2  ;;  %3370 = vmatprep.mubr.f32.mxu1 %v681_v29  ;;  %v357_v50 = vmul.f32 %v4637_v18, %v4503_v15  ;;  %v358_v32 = vmul.f32 %v4656_v45, %v4524_v23 }
  0xd8   : > { %v5404_v2 = vand.u32 4294901760, %v4595_v51  ;;  %v5357_v29 = vand.u32 4294901760, %v4832_v0  ;;  %v4864_v59 = vand.u32 4294901760, %v439_v5  ;;  %v5406_v26 = vand.u32 4294901760, %v4614_v62 }
  0xd9   : > { %v730_v33 = vsub.f32 %v4826_v28, %v5353_v8  ;;  %v740_v15 = vsub.f32 %v4829_v46, %v5354_v40  ;;  %v442_v23 = vsel %vm359_vm0, %v356_v16, 0  ;;  %v820_v51 = vand.u32 4294901760, %v4497_v12 }
  0xda   : > { %3500 = vmatmul.mubr.f32.gmra.mrb[4].mxu0 %v5404_v2  ;;  %5405 = vst [vmem:[#allocation26_spill] sm:$0xff] %v4864_v59  ;;  %3371 = vmatmul.mubr.f32.gmra.mrb[16].mxu1 %v691_v53  ;;  %v711_v18 = vand.u32 4294901760, %v710_v4  ;;  %v721_v45 = vand.u32 4294901760, %v720_v24  ;;  %v4877_v2 = vsub.f32 %v436_v30, %v4853_v1  ;;  %v4883_v8 = vand.u32 4294901760, %v442_v23 }
  0xdb   : > { %3502 = vmatprep.mubr.f32.mxu0 %v5406_v26  ;;  %3373 = vmatprep.mubr.f32.mxu1 %v701_v63  ;;  %v4881_v26 = vsub.f32 %v439_v5, %v4864_v59  ;;  %v827_v40 = vand.u32 4294901760, %v4499_v13  ;;  %v5407_v16 = vand.u32 4294901760, %v4623_v3  ;;  %v445_v53 = vsel %vm359_vm0, %v357_v50, 0 }
  0xdc   : > { %v448_v4 = vsel %vm359_vm0, %v358_v32, 0  ;;  %v821_v30 = vsub.f32 %v4497_v12, %v820_v51  ;;  %v5408_v24 = vand.u32 4294901760, %v4651_v41  ;;  %v731_v63 = vand.u32 4294901760, %v730_v33 }
  0xdd   : > { %v741_v62 = vand.u32 4294901760, %v740_v15  ;;  %v750_v5 = vsub.f32 %v4832_v0, %v5357_v29  ;;  %v3652_v59 = vpack.c.bf16 %v827_v40, %v820_v51  ;;  %v769_v3 = vand.u32 4294901760, %v4877_v2 }
  0xde   : > { %3503 = vmatmul.mubr.f32.gmra.mrb[6].mxu0 %v5407_v16  ;;  %3374 = vmatmul.mubr.f32.gmra.mrb[18].mxu1 %v711_v18  ;;  %v4898_v16 = vsub.f32 %v442_v23, %v4883_v8  ;;  %v4900_v50 = vand.u32 4294901760, %v445_v53  ;;  %v4902_v32 = vand.u32 4294901760, %v448_v4  ;;  %v5409_v12 = vand.u32 4294901760, %v4851_v20 }
  0xdf   : > { %3505 = vmatprep.mubr.f32.mxu0 %v5408_v24  ;;  %3376 = vmatprep.mubr.f32.mxu1 %v721_v45  ;;  %v779_v33 = vand.u32 4294901760, %v4881_v26  ;;  %v822_v15 = vand.u32 4294901760, %v821_v30  ;;  %v828_v51 = vsub.f32 %v4499_v13, %v827_v40  ;;  %v5410_v18 = vand.u32 4294901760, %v4674_v54 }
  0xe0   : > { %v760_v41 = vsub.f32 %v4851_v20, %v5409_v12  ;;  %3653 = vmatprep.subr.bf16.mxu0 %v3652_v59  ;;  %v4912_v23 = vsub.f32 %v445_v53, %v4900_v50  ;;  %v5411_v24 = vand.u32 4294901760, %v4690_v27  ;;  %v751_v29 = vand.u32 4294901760, %v750_v5 }
  0xe1   : > { %3655 = vmatpush3.bf16.msra.mxu0 %v3652_v59  ;;  %v829_v45 = vand.u32 4294901760, %v828_v51  ;;  %v770_v12 = vsub.f32 %v4877_v2, %v769_v3  ;;  %v789_v30 = vand.u32 4294901760, %v4898_v16  ;;  %v4921_v13 = vsub.f32 %v448_v4, %v4902_v32 }
  0xe2   : > { %3506 = vmatmul.mubr.f32.gmra.mrb[8].mxu0 %v5410_v18  ;;  %3377 = vmatmul.mubr.f32.gmra.mrb[20].mxu1 %v731_v63  ;;  %v761_v54 = vand.u32 4294901760, %v760_v41  ;;  %v780_v27 = vsub.f32 %v4881_v26, %v779_v33  ;;  %v799_v40 = vand.u32 4294901760, %v4912_v23  ;;  %v5412_v53 = vand.u32 4294901760, %v4708_v10 }
  0xe3   : > { %3508 = vmatprep.mubr.f32.mxu0 %v5411_v24  ;;  %3657 = vmatprep.subr.bf16.mxu0 %v4495_v11  ;;  %v3640_v59 = vpack.c.bf16 %v829_v45, %v822_v15  ;;  %v5413_v63 = vand.u32 4294901760, %v4712_v49  ;;  %v771_v5 = vand.u32 4294901760, %v770_v12  ;;  %v790_v4 = vsub.f32 %v4898_v16, %v789_v30 }
  0xe4   : > { %3379 = vmatprep.mubr.f32.mxu1 %v741_v62  ;;  %v809_v51 = vand.u32 4294901760, %v4921_v13  ;;  %v781_v62 = vand.u32 4294901760, %v780_v27  ;;  %v800_v41 = vsub.f32 %v4912_v23, %v799_v40  ;;  %v5414_v15 = vand.u32 4294901760, %v4715_v34 }
  0xe5   : > { %3641 = vmatprep.subr.bf16.mxu1 %v3640_v59  ;;  %v5415_v10 = vand.u32 4294901760, %v4731_v38  ;;  %v5416_v45 = vand.u32 4294901760, %v4734_v55  ;;  %v5417_v12 = vand.u32 4294901760, %v4753_v39  ;;  %v5418_v27 = vand.u32 4294901760, %v4772_v60 }
  0xe6   : > { %3509 = vmatmul.mubr.f32.gmra.mrb[10].mxu0 %v5412_v53  ;;  %3380 = vmatmul.mubr.f32.gmra.mrb[22].mxu1 %v751_v29  ;;  %v791_v29 = vand.u32 4294901760, %v790_v4  ;;  %v810_v18 = vsub.f32 %v4921_v13, %v809_v51  ;;  %v801_v24 = vand.u32 4294901760, %v800_v41  ;;  %v5420_v53 = vand.u32 4294901760, %v4794_v37 }
  0xe7   : > { %3511 = vmatprep.mubr.f32.mxu0 %v5413_v63  ;;  %3382 = vmatprep.mubr.f32.mxu1 %v761_v54  ;;  %v5421_v63 = vand.u32 4294901760, %v4808_v25  ;;  %v5423_v4 = vand.u32 4294901760, %v4829_v46  ;;  %v5425_v41 = vand.u32 4294901760, %v4851_v20  ;;  %vm2265_vm2 = vcmask 392192  }
  0xe8   : > { %3643 = vmatpush3.bf16.msra.mxu1 %v3640_v59  ;;  %v811_v54 = vand.u32 4294901760, %v810_v18  ;;  %v5419_v59 = vand.u32 4294901760, %v4787_v57  ;;  %vm2268_vm3 = vcmask 523264   ;;  %vm2271_vm4 = vcmask 654336  }
  0xe9   : > { %3684 = vmatprep.subr.bf16.mxu1 %v4514_v19  ;;  %vm2274_vm5 = vcmask 785408   ;;  %vm2277_vm6 = vcmask 916480  }
  0xea   : > { %3512 = vmatmul.mubr.f32.gmra.mrb[12].mxu0 %v5414_v15  ;;  %3383 = vmatmul.mubr.f32.gmra.mrb[24].mxu1 %v771_v5  ;;  %v5422_v5 = vand.u32 4294901760, %v4826_v28 }
  0xeb   : > { %3514 = vmatprep.mubr.f32.mxu0 %v5415_v10  ;;  %3385 = vmatprep.mubr.f32.mxu1 %v781_v62  ;;  %v5424_v62 = vand.u32 4294901760, %v4832_v0 }
  0xee   : > { %3515 = vmatmul.mubr.f32.gmra.mrb[14].mxu0 %v5416_v45  ;;  %3386 = vmatmul.mubr.f32.gmra.mrb[26].mxu1 %v791_v29 }
  0xef   : > { %3517 = vmatprep.mubr.f32.mxu0 %v5417_v12  ;;  %3388 = vmatprep.mubr.f32.mxu1 %v801_v24 }
  0xf2   : > { %3518 = vmatmul.mubr.f32.gmra.mrb[16].mxu0 %v5418_v27  ;;  %3389 = vmatmul.mubr.f32.gmra.mrb[28].mxu1 %v811_v54 }
  0xf3   : > { %3520 = vmatprep.mubr.f32.mxu0 %v5419_v59  ;;  %3395 = vmatprep.mubr.f32.mxu1 %v4491_v9 }
  0xf6   : > { %3521 = vmatmul.mubr.f32.gmra.mrb[18].mxu0 %v5420_v53  ;;  %3396 = vmatmul.mubr.f32.vlgmr.msra.gmra.mrb[0].mxu1 %v4501_v14 }
  0xf7   : > { %3523 = vmatprep.mubr.f32.mxu0 %v5421_v63  ;;  %3398 = vmatprep.mubr.f32.mxu1 %v4520_v21 }
  0xf8   : > { %3685 = vmatpush3.bf16.msra.mxu1 %v4514_v19  ;;  %v5426_v19 = vld [vmem:[#allocation20_spill] sm:$0xff] }
  0xfa   : > { %3524 = vmatmul.mubr.f32.gmra.mrb[20].mxu0 %v5422_v5  ;;  %3399 = vmatmul.mubr.f32.gmra.mrb[2].mxu1 %v4522_v22 }
  0xfb   : > { %3526 = vmatprep.mubr.f32.mxu0 %v5423_v4  ;;  %3401 = vmatprep.mubr.f32.mxu1 %v4547_v31 }
  0xfe   : > { %3527 = vmatmul.mubr.f32.gmra.mrb[22].mxu0 %v5424_v62  ;;  %3402 = vmatmul.mubr.f32.gmra.mrb[4].mxu1 %v4578_v44 }
  0xff   : > { %3529 = vmatprep.mubr.f32.mxu0 %v5425_v41  ;;  %3404 = vmatprep.mubr.f32.mxu1 %v4597_v52 }
 0x102   : > { %3530 = vmatmul.mubr.f32.gmra.mrb[24].mxu0 %v769_v3  ;;  %3405 = vmatmul.mubr.f32.gmra.mrb[6].mxu1 %v4604_v58  ;;  %v5427_v3 = vld [vmem:[#allocation21_spill] sm:$0xff] }
 0x103   : > { %3532 = vmatprep.mubr.f32.mxu0 %v779_v33  ;;  %3407 = vmatprep.mubr.f32.mxu1 %v4634_v17  ;;  %v5428_v33 = vld [vmem:[#allocation22_spill] sm:$0xff] }
 0x106   : > { %3533 = vmatmul.mubr.f32.gmra.mrb[26].mxu0 %v789_v30  ;;  %3408 = vmatmul.mubr.f32.gmra.mrb[8].mxu1 %v4653_v42  ;;  %v5429_v30 = vld [vmem:[#allocation23_spill] sm:$0xff] }
 0x107   : > { %3535 = vmatprep.mubr.f32.mxu0 %v799_v40  ;;  %3410 = vmatprep.mubr.f32.mxu1 %v4677_v56  ;;  %v5430_v40 = vld [vmem:[#allocation24_spill] sm:$0xff] }
 0x10a   : > { %3536 = vmatmul.mubr.f32.gmra.mrb[28].mxu0 %v809_v51  ;;  %3411 = vmatmul.mubr.f32.gmra.mrb[10].mxu1 %v4692_v6  ;;  %v5431_v51 = vld [vmem:[#allocation25_spill] sm:$0xff] }
 0x10b   : > { %3542 = vmatprep.mubr.f32.mxu0 %v4491_v9  ;;  %3413 = vmatprep.mubr.f32.mxu1 %v5426_v19 }
 0x10e   : > { %3543 = vmatmul.mubr.f32.vlgmr.msra.gmra.mrb[0].mxu0 %v4501_v14  ;;  %3414 = vmatmul.mubr.f32.gmra.mrb[12].mxu1 %v5427_v3 }
 0x10f   : > { %3545 = vmatprep.mubr.f32.mxu0 %v4520_v21  ;;  %3659 = vmatpush3.bf16.msra.mxu0 %v4495_v11  ;;  %v5432_v11 = vld [vmem:[#allocation26_spill] sm:$0xff] }
 0x110   : > { %3416 = vmatprep.mubr.f32.mxu1 %v5428_v33 }
 0x112   : > { %3546 = vmatmul.mubr.f32.gmra.mrb[2].mxu0 %v4522_v22  ;;  %3417 = vmatmul.mubr.f32.gmra.mrb[14].mxu1 %v5429_v30 }
 0x113   : > { %3548 = vmatprep.mubr.f32.mxu0 %v4547_v31  ;;  %3419 = vmatprep.mubr.f32.mxu1 %v5430_v40 }
 0x116   : > { %3549 = vmatmul.mubr.f32.gmra.mrb[4].mxu0 %v4578_v44  ;;  %3420 = vmatmul.mubr.f32.gmra.mrb[16].mxu1 %v5431_v51 }
 0x117   : > { %3551 = vmatprep.mubr.f32.mxu0 %v4597_v52  ;;  %3422 = vmatprep.mubr.f32.mxu1 %v4774_v43 }
 0x11a   : > { %3552 = vmatmul.mubr.f32.gmra.mrb[6].mxu0 %v4604_v58  ;;  %3423 = vmatmul.mubr.f32.gmra.mrb[18].mxu1 %v4778_v7 }
 0x11b   : > { %3554 = vmatprep.mubr.f32.mxu0 %v4634_v17  ;;  %3425 = vmatprep.mubr.f32.mxu1 %v4789_v35 }
 0x11e   : > { %3555 = vmatmul.mubr.f32.gmra.mrb[8].mxu0 %v4653_v42  ;;  %3426 = vmatmul.mubr.f32.gmra.mrb[20].mxu1 %v4811_v48 }
 0x11f   : > { %3557 = vmatprep.mubr.f32.mxu0 %v4677_v56  ;;  %3428 = vmatprep.mubr.f32.mxu1 %v4813_v47 }
 0x122   : > { %3558 = vmatmul.mubr.f32.gmra.mrb[10].mxu0 %v4692_v6  ;;  %3429 = vmatmul.mubr.f32.gmra.mrb[22].mxu1 %v4815_v36 }
 0x123   : > { %3560 = vmatprep.mubr.f32.mxu0 %v5426_v19  ;;  %3431 = vmatprep.mubr.f32.mxu1 %v4838_v61 }
 0x126   : > { %3561 = vmatmul.mubr.f32.gmra.mrb[12].mxu0 %v5427_v3  ;;  %3432 = vmatmul.mubr.f32.gmra.mrb[24].mxu1 %v4853_v1 }
 0x127   : > { %3563 = vmatprep.mubr.f32.mxu0 %v5428_v33  ;;  %3434 = vmatprep.mubr.f32.mxu1 %v5432_v11 }
 0x12a   : > { %3564 = vmatmul.mubr.f32.gmra.mrb[14].mxu0 %v5429_v30  ;;  %3435 = vmatmul.mubr.f32.gmra.mrb[26].mxu1 %v4883_v8 }
 0x12b   : > { %3566 = vmatprep.mubr.f32.mxu0 %v5430_v40  ;;  %3437 = vmatprep.mubr.f32.mxu1 %v4900_v50 }
 0x12e   : > { %3567 = vmatmul.mubr.f32.gmra.mrb[16].mxu0 %v5431_v51  ;;  %3438 = vmatmul.mubr.f32.gmra.mrb[28].mxu1 %v4902_v32 }
 0x12f   : > { %3569 = vmatprep.mubr.f32.mxu0 %v4774_v43  ;;  %3462 = vmatprep.mubr.f32.mxu1 %v4712_v49 }
 0x132   : > { %3570 = vmatmul.mubr.f32.gmra.mrb[18].mxu0 %v4778_v7  ;;  %3463 = vmatmul.mubr.f32.vlgmr.msra.gmra.mrb[12].mxu1 %v4715_v34 }
 0x133   : > { %3572 = vmatprep.mubr.f32.mxu0 %v4789_v35  ;;  %3465 = vmatprep.mubr.f32.mxu1 %v4731_v38 }
 0x136   : > { %3573 = vmatmul.mubr.f32.gmra.mrb[20].mxu0 %v4811_v48  ;;  %3466 = vmatmul.mubr.f32.gmra.mrb[14].mxu1 %v4734_v55 }
 0x137   : > { %3575 = vmatprep.mubr.f32.mxu0 %v4813_v47  ;;  %3468 = vmatprep.mubr.f32.mxu1 %v4753_v39 }
 0x13a   : > { %3576 = vmatmul.mubr.f32.gmra.mrb[22].mxu0 %v4815_v36  ;;  %3469 = vmatmul.mubr.f32.gmra.mrb[16].mxu1 %v4772_v60 }
 0x13b   : > { %3578 = vmatprep.mubr.f32.mxu0 %v4838_v61  ;;  %3471 = vmatprep.mubr.f32.mxu1 %v4787_v57 }
 0x13e   : > { %3579 = vmatmul.mubr.f32.gmra.mrb[24].mxu0 %v4853_v1  ;;  %3472 = vmatmul.mubr.f32.gmra.mrb[18].mxu1 %v4794_v37 }
 0x13f   : > { %3581 = vmatprep.mubr.f32.mxu0 %v5432_v11  ;;  %3474 = vmatprep.mubr.f32.mxu1 %v4808_v25 }
 0x142   : > { %3582 = vmatmul.mubr.f32.gmra.mrb[26].mxu0 %v4883_v8  ;;  %3475 = vmatmul.mubr.f32.gmra.mrb[20].mxu1 %v4826_v28 }
 0x143   : > { %3584 = vmatprep.mubr.f32.mxu0 %v4900_v50  ;;  %3477 = vmatprep.mubr.f32.mxu1 %v4829_v46 }
 0x146   : > { %3585 = vmatmul.mubr.f32.gmra.mrb[28].mxu0 %v4902_v32  ;;  %3478 = vmatmul.mubr.f32.gmra.mrb[22].mxu1 %v4832_v0 }
 0x147   : > { %3591 = vmatprep.mubr.f32.mxu0 %v4491_v9  ;;  %3480 = vmatprep.mubr.f32.mxu1 %v4851_v20 }
 0x14a   : > { %3592 = vmatmul.mubr.f32.vlgmr.msra.gmra.mrb[0].mxu0 %v4501_v14  ;;  %3481 = vmatmul.mubr.f32.gmra.mrb[24].mxu1 %v4877_v2 }
 0x14b   : > { %3594 = vmatprep.mubr.f32.mxu0 %v4520_v21  ;;  %3483 = vmatprep.mubr.f32.mxu1 %v4881_v26 }
 0x14e   : > { %3595 = vmatmul.mubr.f32.gmra.mrb[2].mxu0 %v4522_v22  ;;  %3484 = vmatmul.mubr.f32.gmra.mrb[26].mxu1 %v4898_v16 }
 0x14f   : > { %3597 = vmatprep.mubr.f32.mxu0 %v4547_v31  ;;  %3486 = vmatprep.mubr.f32.mxu1 %v4912_v23 }
 0x152   : > { %3598 = vmatmul.mubr.f32.gmra.mrb[4].mxu0 %v4578_v44  ;;  %3487 = vmatmul.mubr.f32.gmra.mrb[28].mxu1 %v4921_v13 }
 0x153   : > { %3600 = vmatprep.mubr.f32.mxu0 %v4597_v52 }
 0x156   : > { %3601 = vmatmul.mubr.f32.gmra.mrb[6].mxu0 %v4604_v58 }
 0x157   : > { %3603 = vmatprep.mubr.f32.mxu0 %v4634_v17 }
 0x15a   : > { %3604 = vmatmul.mubr.f32.gmra.mrb[8].mxu0 %v4653_v42 }
 0x15b   : > { %3606 = vmatprep.mubr.f32.mxu0 %v4677_v56 }
 0x15e   : > { %3607 = vmatmul.mubr.f32.gmra.mrb[10].mxu0 %v4692_v6 }
 0x15f   : > { %3609 = vmatprep.mubr.f32.mxu0 %v5426_v19 }
 0x162   : > { %3610 = vmatmul.mubr.f32.gmra.mrb[12].mxu0 %v5427_v3 }
 0x163   : > { %3612 = vmatprep.mubr.f32.mxu0 %v5428_v33 }
 0x166   : > { %3613 = vmatmul.mubr.f32.gmra.mrb[14].mxu0 %v5429_v30 }
 0x167   : > { %3615 = vmatprep.mubr.f32.mxu0 %v5430_v40 }
 0x16a   : > { %3616 = vmatmul.mubr.f32.gmra.mrb[16].mxu0 %v5431_v51 }
 0x16b   : > { %3618 = vmatprep.mubr.f32.mxu0 %v4774_v43 }
 0x16e   : > { %3619 = vmatmul.mubr.f32.gmra.mrb[18].mxu0 %v4778_v7 }
 0x16f   : > { %3621 = vmatprep.mubr.f32.mxu0 %v4789_v35 }
 0x172   : > { %3622 = vmatmul.mubr.f32.gmra.mrb[20].mxu0 %v4811_v48 }
 0x173   : > { %3624 = vmatprep.mubr.f32.mxu0 %v4813_v47 }
 0x176   : > { %3625 = vmatmul.mubr.f32.gmra.mrb[22].mxu0 %v4815_v36 }
 0x177   : > { %3627 = vmatprep.mubr.f32.mxu0 %v4838_v61 }
 0x17a   : > { %3628 = vmatmul.mubr.f32.gmra.mrb[24].mxu0 %v4853_v1 }
 0x17b   : > { %3630 = vmatprep.mubr.f32.mxu0 %v5432_v11 }
 0x17e   : > { %3631 = vmatmul.mubr.f32.gmra.mrb[26].mxu0 %v4883_v8 }
 0x17f   : > { %3633 = vmatprep.mubr.f32.mxu0 %v4900_v50 }
 0x182   : > { %3634 = vmatmul.mubr.f32.gmra.mrb[28].mxu0 %v4902_v32 }
 0x1c9   : > { %v3397_v9 = vpop.f32.mrb[0].mxu1 }
 0x1ca   : > { %v894_v14 = vpop.f32.mrb[1].mxu1 }
 0x1cd   : > { %v3400_v21 = vpop.f32.mrb[2].mxu1 }
 0x1ce   : > { %v906_v22 = vpop.f32.mrb[3].mxu1 }
 0x1d1   : > { %v3403_v31 = vpop.f32.mrb[4].mxu1 }
 0x1d2   : > { %v918_v38 = vpop.f32.mrb[5].mxu1 }
 0x1d5   : > { %v3406_v39 = vpop.f32.mrb[6].mxu1 }
 0x1d6   : > { %v930_v44 = vpop.f32.mrb[7].mxu1 }
 0x1d9   : > { %v3409_v49 = vpop.f32.mrb[8].mxu1 }
 0x1da   : > { %v942_v52 = vpop.f32.mrb[9].mxu1 }
 0x1dd   : > { %v3412_v58 = vpop.f32.mrb[10].mxu1 }
 0x1de   : > { %v954_v17 = vpop.f32.mrb[11].mxu1 }
 0x205   : > { %v3464_v42 = vpop.f32.mrb[12].mxu1 }
 0x206   : > { %v1228_v56 = vpop.f32.mrb[13].mxu1 }
 0x209   : > { %v3467_v6 = vpop.f32.mrb[14].mxu1 }
 0x20a   : > { %v5071_v7 = vpop.f32.mrb[15].mxu1 }
 0x20d   : > { %v5073_v34 = vpop.f32.mrb[16].mxu1 }
 0x20e   : > { %v5075_v35 = vpop.f32.mrb[17].mxu1 }
 0x211   : > { %v5077_v55 = vpop.f32.mrb[18].mxu1 }
 0x212   : > { %v5079_v43 = vpop.f32.mrb[19].mxu1 }
 0x215   : > { %v5081_v48 = vpop.f32.mrb[20].mxu1 }
 0x216   : > { %v5083_v60 = vpop.f32.mrb[21].mxu1 }
 0x219   : > { %v5085_v28 = vpop.f32.mrb[22].mxu1 }
 0x21a   : > { %v5087_v57 = vpop.f32.mrb[23].mxu1 }
 0x21d   : > { %v3593_v37 = vpop.f32.mrb[0].mxu0  ;;  %v5093_v36 = vpop.f32.mrb[24].mxu1 }
 0x21e   : > { %v5089_v25 = vadd.f32 %v3593_v37, %v3397_v9  ;;  %v1978_v46 = vpop.f32.mrb[1].mxu0  ;;  %v5095_v0 = vpop.f32.mrb[25].mxu1 }
 0x21f   : > { %v5091_v47 = vadd.f32 %v1978_v46, %v894_v14 }
 0x221   : > { %v3596_v61 = vpop.f32.mrb[2].mxu0  ;;  %v5097_v2 = vpop.f32.mrb[26].mxu1 }
 0x222   : > { %v3688_v8 = vadd.f32 %v3596_v61, %v3400_v21  ;;  %v1990_v20 = vpop.f32.mrb[3].mxu0  ;;  %v5100_v26 = vpop.f32.mrb[27].mxu1 }
 0x223   : > { %v3689_v1 = vadd.f32 %v1990_v20, %v906_v22 }
 0x224   : > { %2160 = vrot.lane.b32.xlu0 %v3688_v8, %s4183_s29 }
 0x225   : > { %v3599_v16 = vpop.f32.mrb[4].mxu0  ;;  %v5102_v13 = vpop.f32.mrb[28].mxu1 }
 0x226   : > { %v3690_v50 = vadd.f32 %v3599_v16, %v3403_v31  ;;  %v2002_v32 = vpop.f32.mrb[5].mxu0  ;;  %v5106_v15 = vpop.f32.mrb[29].mxu1 }
 0x227   : > { %v3691_v23 = vadd.f32 %v2002_v32, %v918_v38 }
 0x228   : > { %2158 = vrot.lane.b32.xlu0 %v3689_v1, %s4183_s29  ;;  %2168 = vrot.lane.b32.xlu1 %v3690_v50, %s4184_s9 }
 0x229   : > { %v3602_v10 = vpop.f32.mrb[6].mxu0 }
 0x22a   : > { %v3692_v29 = vadd.f32 %v3602_v10, %v3406_v39  ;;  %v2014_v18 = vpop.f32.mrb[7].mxu0 }
 0x22b   : > { %v3693_v24 = vadd.f32 %v2014_v18, %v930_v44 }
 0x22c   : > { %2166 = vrot.lane.b32.xlu0 %v3691_v23, %s4184_s9  ;;  %2176 = vrot.lane.b32.xlu1 %v3692_v29, %s4185_s3 }
 0x22d   : > { %v3605_v45 = vpop.f32.mrb[8].mxu0 }
 0x22e   : > { %v3694_v12 = vadd.f32 %v3605_v45, %v3409_v49  ;;  %v2026_v54 = vpop.f32.mrb[9].mxu0 }
 0x22f   : > { %v3695_v27 = vadd.f32 %v2026_v54, %v942_v52 }
 0x230   : > { %2174 = vrot.lane.b32.xlu0 %v3693_v24, %s4185_s3  ;;  %2184 = vrot.lane.b32.xlu1 %v3694_v12, %s4186_s10  ;;  %v327_v24 = vld [vmem:[#allocation7] sm:$0xff] }
 0x231   : > { %v3608_v59 = vpop.f32.mrb[10].mxu0  ;;  %v2293_v12 = vsel %vm359_vm0, %v327_v24, 0 }
 0x232   : > { %v3696_v53 = vadd.f32 %v3608_v59, %v3412_v58  ;;  %v2038_v63 = vpop.f32.mrb[11].mxu0  ;;  %v5150_v59 = vand.u32 4294901760, %v2293_v12 }
 0x233   : > { %v3697_v5 = vadd.f32 %v2038_v63, %v954_v17 }
 0x234   : > { %2182 = vrot.lane.b32.xlu0 %v3695_v27, %s4186_s10  ;;  %2192 = vrot.lane.b32.xlu1 %v3696_v53, %s4187_s26  ;;  %v328_v53 = vld [vmem:[#allocation7 + $0x8] sm:$0xff] }
 0x235   : > { %v3611_v4 = vpop.f32.mrb[12].mxu0 }
 0x236   : > { %v3698_v62 = vadd.f32 %v3611_v4, %v3464_v42  ;;  %v2050_v41 = vpop.f32.mrb[13].mxu0 }
 0x237   : > { %v3699_v19 = vadd.f32 %v2050_v41, %v1228_v56 }
 0x238   : > { %2190 = vrot.lane.b32.xlu0 %v3697_v5, %s4187_s26  ;;  %2200 = vrot.lane.b32.xlu1 %v3698_v62, %s4188_s28  ;;  %v2296_v62 = vsel %vm359_vm0, %v328_v53, 0 }
 0x239   : > { %v3614_v3 = vpop.f32.mrb[14].mxu0 }
 0x23a   : > { %v3700_v33 = vadd.f32 %v3614_v3, %v3467_v6  ;;  %v2062_v30 = vpop.f32.mrb[15].mxu0 }
 0x23b   : > { %v3701_v40 = vadd.f32 %v2062_v30, %v5071_v7 }
 0x23c   : > { %2198 = vrot.lane.b32.xlu0 %v3699_v19, %s4188_s28  ;;  %v5157_v19 = vsub.f32 %v2293_v12, %v5150_v59 }
 0x23d   : > { %v3617_v51 = vpop.f32.mrb[16].mxu0 }
 0x23e   : > { %v5119_v11 = vadd.f32 %v3617_v51, %v5073_v34  ;;  %v2074_v9 = vpop.f32.mrb[17].mxu0 }
 0x23f   : > { %v5122_v14 = vadd.f32 %v2074_v9, %v5075_v35  ;;  %v5165_v9 = vand.u32 4294901760, %v2296_v62 }
 0x241   : > { %v3620_v21 = vpop.f32.mrb[18].mxu0 }
 0x242   : > { %v3704_v22 = vadd.f32 %v3620_v21, %v5077_v55  ;;  %v2086_v31 = vpop.f32.mrb[19].mxu0 }
 0x243   : > { %v3705_v38 = vadd.f32 %v2086_v31, %v5079_v43 }
 0x244   : > { %2216 = vrot.lane.b32.xlu1 %v3704_v22, %s4183_s29 }
 0x245   : > { %v3623_v39 = vpop.f32.mrb[20].mxu0 }
 0x246   : > { %v3706_v44 = vadd.f32 %v3623_v39, %v5081_v48  ;;  %v2098_v49 = vpop.f32.mrb[21].mxu0 }
 0x247   : > { %v3707_v52 = vadd.f32 %v2098_v49, %v5083_v60 }
 0x248   : > { %2214 = vrot.lane.b32.xlu1 %v3705_v38, %s4183_s29 }
 0x249   : > { %v3626_v58 = vpop.f32.mrb[22].mxu0  ;;  %2222 = vrot.lane.b32.xlu0 %v3707_v52, %s4184_s9 }
 0x24a   : > { %v3708_v17 = vadd.f32 %v3626_v58, %v5085_v28  ;;  %v2110_v42 = vpop.f32.mrb[23].mxu0 }
 0x24b   : > { %v3709_v56 = vadd.f32 %v2110_v42, %v5087_v57 }
 0x24c   : > { %2224 = vrot.lane.b32.xlu1 %v3706_v44, %s4184_s9 }
 0x24d   : > { %v3629_v6 = vpop.f32.mrb[24].mxu0  ;;  %2230 = vrot.lane.b32.xlu0 %v3709_v56, %s4185_s3 }
 0x24e   : > { %v3710_v7 = vadd.f32 %v3629_v6, %v5093_v36  ;;  %v2122_v34 = vpop.f32.mrb[25].mxu0  ;;  %v4189_v36 = vmov 0.0  }
 0x24f   : > { %v3711_v35 = vadd.f32 %v2122_v34, %v5095_v0  ;;  %2366 = vmatprep.mubr.f32.mxu1 %v4189_v36 }
 0x250   : > { %2232 = vrot.lane.b32.xlu1 %v3708_v17, %s4185_s3 }
 0x251   : > { %v3632_v55 = vpop.f32.mrb[26].mxu0  ;;  %2238 = vrot.lane.b32.xlu0 %v3711_v35, %s4186_s10 }
 0x252   : > { %v3712_v43 = vadd.f32 %v3632_v55, %v5097_v2  ;;  %v2134_v48 = vpop.f32.mrb[27].mxu0 }
 0x253   : > { %v3713_v60 = vadd.f32 %v2134_v48, %v5100_v26 }
 0x254   : > { %2240 = vrot.lane.b32.xlu1 %v3710_v7, %s4186_s10  ;;  %v5182_v7 = vsub.f32 %v2296_v62, %v5165_v9 }
 0x255   : > { %v3635_v28 = vpop.f32.mrb[28].mxu0  ;;  %2246 = vrot.lane.b32.xlu0 %v3713_v60, %s4187_s26 }
 0x256   : > { %v3714_v57 = vadd.f32 %v3635_v28, %v5102_v13  ;;  %v2146_v37 = vpop.f32.mrb[29].mxu0 }
 0x257   : > { %v3715_v46 = vadd.f32 %v2146_v37, %v5106_v15 }
 0x258   : > { %2248 = vrot.lane.b32.xlu1 %v3712_v43, %s4187_s26 }
 0x259   : > { %2254 = vrot.lane.b32.xlu0 %v3715_v46, %s4188_s28 }
 0x25c   : > { %2256 = vrot.lane.b32.xlu1 %v3714_v57, %s4188_s28 }
 0x25d   : > { %2206 = vrot.lane.b32.xlu0 %v3701_v40, %s4190_s14 }
 0x260   : > { %2208 = vrot.lane.b32.xlu1 %v3700_v33, %s4190_s14 }
 0x296   : > { %v2161_v0 = vpop.permute.xlu0 %2160 }
 0x297   : > { %v2261_v44 = vsel %vm359_vm0, %v5089_v25, %v2161_v0 }
 0x29a   : > { %v2159_v61 = vpop.permute.xlu0 %2158  ;;  %v2169_v8 = vpop.permute.xlu1 %2168 }
 0x29b   : > { %v2260_v33 = vsel %vm359_vm0, %v5091_v47, %v2159_v61  ;;  %v2264_v17 = vsel %vm2262_vm1, %v2261_v44, %v2169_v8 }
 0x29e   : > { %v2167_v20 = vpop.permute.xlu0 %2166  ;;  %v2177_v1 = vpop.permute.xlu1 %2176 }
 0x29f   : > { %v2267_v34 = vsel %vm2265_vm2, %v2264_v17, %v2177_v1  ;;  %v2940_v17 = vlaneseq }
 0x2a2   : > { %v2175_v2 = vpop.permute.xlu0 %2174  ;;  %v2185_v26 = vpop.permute.xlu1 %2184 }
 0x2a3   : > { %v2270_v48 = vsel %vm2268_vm3, %v2267_v34, %v2185_v26 }
 0x2a6   : > { %v2183_v16 = vpop.permute.xlu0 %2182  ;;  %v2193_v50 = vpop.permute.xlu1 %2192 }
 0x2a7   : > { %v2273_v57 = vsel %vm2271_vm4, %v2270_v48, %v2193_v50 }
 0x2aa   : > { %v2191_v32 = vpop.permute.xlu0 %2190  ;;  %v2201_v23 = vpop.permute.xlu1 %2200 }
 0x2ab   : > { %v2276_v0 = vsel %vm2274_vm5, %v2273_v57, %v2201_v23 }
 0x2ae   : > { %v2199_v15 = vpop.permute.xlu0 %2198 }
 0x2b6   : > { %v2217_v13 = vpop.permute.xlu1 %2216 }
 0x2b7   : > { %v2281_v30 = vsel %vm359_vm0, %v5119_v11, %v2217_v13  ;;  %v2369_v11 = vand.u32 4294901760, %v5157_v19 }
 0x2b9   : > { %v2370_v1 = vsub.f32 %v5157_v19, %v2369_v11 }
 0x2ba   : > { %v2215_v10 = vpop.permute.xlu1 %2214 }
 0x2bb   : > { %v2223_v29 = vpop.permute.xlu0 %2222  ;;  %v2280_v63 = vsel %vm359_vm0, %v5122_v14, %v2215_v10  ;;  %v2263_v14 = vsel %vm2262_vm1, %v2260_v33, %v2167_v20 }
 0x2bc   : > { %v2282_v41 = vsel %vm2262_vm1, %v2280_v63, %v2223_v29  ;;  %v2266_v38 = vsel %vm2265_vm2, %v2263_v14, %v2175_v2 }
 0x2bd   : > { %v2269_v49 = vsel %vm2268_vm3, %v2266_v38, %v2183_v16 }
 0x2be   : > { %v2225_v18 = vpop.permute.xlu1 %2224  ;;  %v2272_v42 = vsel %vm2271_vm4, %v2269_v49, %v2191_v32  ;;  %v2380_v32 = vand.u32 4294901760, %v5182_v7 }
 0x2bf   : > { %v2231_v45 = vpop.permute.xlu0 %2230  ;;  %v2283_v21 = vsel %vm2262_vm1, %v2281_v30, %v2225_v18  ;;  %v2275_v35 = vsel %vm2274_vm5, %v2272_v42, %v2199_v15 }
 0x2c0   : > { %v2284_v3 = vsel %vm2265_vm2, %v2282_v41, %v2231_v45  ;;  %v2371_v45 = vand.u32 4294901760, %v2370_v1 }
 0x2c2   : > { %v2233_v54 = vpop.permute.xlu1 %2232 }
 0x2c3   : > { %v2239_v27 = vpop.permute.xlu0 %2238  ;;  %v2285_v47 = vsel %vm2265_vm2, %v2283_v21, %v2233_v54  ;;  %v2381_v54 = vsub.f32 %v5182_v7, %v2380_v32 }
 0x2c4   : > { %v2286_v40 = vsel %vm2268_vm3, %v2284_v3, %v2239_v27 }
 0x2c5   : > { %v2382_v3 = vand.u32 4294901760, %v2381_v54 }
 0x2c6   : > { %v2241_v5 = vpop.permute.xlu1 %2240 }
 0x2c7   : > { %v2247_v4 = vpop.permute.xlu0 %2246  ;;  %v2287_v52 = vsel %vm2268_vm3, %v2285_v47, %v2241_v5 }
 0x2c8   : > { %v2288_v22 = vsel %vm2271_vm4, %v2286_v40, %v2247_v4 }
 0x2ca   : > { %v2249_v51 = vpop.permute.xlu1 %2248 }
 0x2cb   : > { %v2255_v31 = vpop.permute.xlu0 %2254  ;;  %v2289_v56 = vsel %vm2271_vm4, %v2287_v52, %v2249_v51 }
 0x2cc   : > { %v2290_v39 = vsel %vm2274_vm5, %v2288_v22, %v2255_v31 }
 0x2cd   : > { %v2298_v58 = vand.u32 4294901760, %v2290_v39 }
 0x2ce   : > { %v2257_v6 = vpop.permute.xlu1 %2256 }
 0x2cf   : > { %v2390_v25 = vsub.f32 %v2290_v39, %v2298_v58  ;;  %v2291_v55 = vsel %vm2274_vm5, %v2289_v56, %v2257_v6  ;;  %v2207_v43 = vpop.permute.xlu0 %2206  ;;  %v2874_v56 = vstv %s3138_s11  ;;  %v2941_v6 = vshrl.u32 %v2940_v17, 7 }
 0x2d0   : > { %v2302_v60 = vand.u32 4294901760, %v2291_v55  ;;  %v2278_v28 = vsel %vm2277_vm6, %v2275_v35, %v2207_v43 }
 0x2d1   : > { %v2391_v37 = vand.u32 4294901760, %v2390_v25  ;;  %v2300_v46 = vand.u32 4294901760, %v2278_v28  ;;  %vm2945_vm7 = vcmp.lt.s32.totalorder %v2941_v6, 6 }
 0x2d2   : > { %v2402_v61 = vsub.f32 %v2291_v55, %v2302_v60  ;;  %v2209_v8 = vpop.permute.xlu1 %2208  ;;  %v3660_v20 = vpack.c.bf16 %v2302_v60, %v2298_v58 }
 0x2d3   : > { %v2396_v2 = vsub.f32 %v2278_v28, %v2300_v46  ;;  %v2279_v16 = vsel %vm2277_vm6, %v2276_v0, %v2209_v8  ;;  %v2392_v26 = vsub.f32 %v2390_v25, %v2391_v37 }
 0x2d4   : > { %v2403_v13 = vand.u32 4294901760, %v2402_v61  ;;  %v2304_v15 = vand.u32 4294901760, %v2279_v16  ;;  %3661 = vmatprep.subr.bf16.mxu1 %v3660_v20  ;;  %v3668_v50 = vpack.c.bf16 %v2402_v61, %v2390_v25 }
 0x2d5   : > { %v2397_v10 = vand.u32 4294901760, %v2396_v2  ;;  %v2393_v12 = vand.u32 4294901760, %v2392_v26 }
 0x2d6   : > { %v3662_v29 = vpack.c.bf16 %v2304_v15, %v2300_v46  ;;  %v2408_v23 = vsub.f32 %v2279_v16, %v2304_v15  ;;  %v2404_v18 = vsub.f32 %v2402_v61, %v2403_v13  ;;  %v3676_v24 = vpack.c.bf16 %v2403_v13, %v2391_v37 }
 0x2d7   : > { %v2398_v27 = vsub.f32 %v2396_v2, %v2397_v10 }
 0x2d8   : > { %v2409_v53 = vand.u32 4294901760, %v2408_v23  ;;  %v3670_v63 = vpack.c.bf16 %v2408_v23, %v2396_v2  ;;  %3663 = vmatpush1.bf16.msra.mxu1 %v3662_v29  ;;  %v2405_v5 = vand.u32 4294901760, %v2404_v18 }
 0x2d9   : > { %v2399_v33 = vand.u32 4294901760, %v2398_v27 }
 0x2da   : > { %v2410_v4 = vsub.f32 %v2408_v23, %v2409_v53  ;;  %v3664_v62 = vpack.c.bf16 %v2405_v5, %v2393_v12  ;;  %v3678_v41 = vpack.c.bf16 %v2409_v53, %v2397_v10 }
 0x2db   : > { %2372 = vmatmul.mubr.f32.vlgmr.msra.gmra.mrb[30].mxu1 %v2371_v45 }
 0x2dc   : > { %v2411_v30 = vand.u32 4294901760, %v2410_v4  ;;  %3665 = vmatprep.subr.bf16.mxu1 %v3664_v62  ;;  %2377 = vmatprep.mubr.f32.mxu1 %v4189_v36 }
 0x2de   : > { %v3666_v40 = vpack.c.bf16 %v2411_v30, %v2399_v33 }
 0x2df   : > { %2383 = vmatmul.mubr.f32.gmra.mrb[32].mxu1 %v2382_v3 }
 0x2e0   : > { %3667 = vmatpush1.bf16.msra.mxu1 %v3666_v40  ;;  %2473 = vmatprep.mubr.f32.mxu1 %v4189_v36 }
 0x2e1   : > { %3669 = vmatprep.subr.bf16.mxu1 %v3668_v50  ;;  %v2895_v50 = vstv %s323_s16 }
 0x2e3   : > { %2475 = vmatmul.mubr.f32.vlgmr.msra.gmra.mrb[30].mxu1 %v5150_v59 }
 0x2e4   : > { %3671 = vmatpush1.bf16.msra.mxu1 %v3670_v63  ;;  %2480 = vmatprep.mubr.f32.mxu1 %v4189_v36 }
 0x2e5   : > { %3673 = vmatprep.subr.bf16.mxu1 %v3660_v20 }
 0x2e7   : > { %2482 = vmatmul.mubr.f32.gmra.mrb[32].mxu1 %v5165_v9 }
 0x2e8   : > { %2560 = vmatprep.mubr.f32.mxu1 %v4189_v36 }
 0x2eb   : > { %2563 = vmatmul.mubr.f32.vlgmr.msra.gmra.mrb[30].mxu1 %v5157_v19 }
 0x2ec   : > { %3675 = vmatpush1.bf16.msra.mxu1 %v3662_v29  ;;  %2568 = vmatprep.mubr.f32.mxu1 %v4189_v36 }
 0x2ed   : > { %3677 = vmatprep.subr.bf16.mxu1 %v3676_v24 }
 0x2ef   : > { %2571 = vmatmul.mubr.f32.gmra.mrb[32].mxu1 %v5182_v7  ;;  %v2944_v7 = vand.u32 127, %v2940_v17 }
 0x2f0   : > { %2645 = vmatprep.mubr.f32.mxu1 %v4189_v36 }
 0x2f1   : > { %vm2947_vm8 = vcmp.lt.s32.totalorder %v2944_v7, 6 }
 0x2f2   : > { %vm2948_vm9 = vmand %vm2945_vm7, %vm2947_vm8 }
 0x2f3   : > { %2649 = vmatmul.mubr.f32.vlgmr.msra.gmra.mrb[30].mxu1 %v2369_v11 }
 0x2f4   : > { %3679 = vmatpush1.bf16.msra.mxu1 %v3678_v41  ;;  %2654 = vmatprep.mubr.f32.mxu1 %v4189_v36 }
 0x2f5   : > { %3681 = vmatprep.subr.bf16.mxu1 %v3660_v20  ;;  %v3139_v20 = vsel %vm2948_vm9, 1.0, %v4189_v36 }
 0x2f6   : > { %v3953_v26 = vpack.i.bf16 %v4189_v36, %v3139_v20 }
 0x2f7   : > { %2658 = vmatmul.mubr.f32.gmra.mrb[32].mxu1 %v2380_v32 }
 0x2f8   : > { %2740 = vmatprep.mubr.f32.mxu1 %v4189_v36 }
 0x2fb   : > { %2742 = vmatmul.mubr.f32.vlgmr.msra.gmra.mrb[30].mxu1 %v5150_v59 }
 0x2fc   : > { %3683 = vmatpush1.bf16.msra.mxu1 %v3662_v29  ;;  %2747 = vmatprep.mubr.f32.mxu1 %v4189_v36 }
 0x2ff   : > { %2749 = vmatmul.mubr.f32.gmra.mrb[32].mxu1 %v5165_v9 }
 0x300   : > { %2823 = vmatprep.mubr.f32.mxu1 %v4189_v36 }
 0x303   : > { %2825 = vmatmul.mubr.f32.vlgmr.msra.gmra.mrb[30].mxu1 %v5150_v59 }
 0x304   : > { %2830 = vmatprep.mubr.f32.mxu1 %v4189_v36 }
 0x307   : > { %2832 = vmatmul.mubr.f32.gmra.mrb[32].mxu1 %v5165_v9 }
 0x3d6   : > { %v2826_v19 = vpop.f32.mrb[30].mxu1 }
 0x3d7   : > { %v2828_v51 = vpop.f32.mrb[31].mxu1  ;;  %v2838_v14 = vmul.f32 %v2826_v19, %v2826_v19 }
 0x3d9   : > { %2852 = vrot.lane.b32.xlu0 %v2838_v14, %s4188_s28 }
 0x3da   : > { %v2833_v21 = vpop.f32.mrb[32].mxu1 }
 0x3db   : > { %v2835_v22 = vpop.f32.mrb[33].mxu1  ;;  %v2839_v31 = vmul.f32 %v2833_v21, %v2833_v21 }
 0x3dd   : > { %2842 = vrot.lane.b32.xlu0 %v2826_v19, %s4187_s26  ;;  %2854 = vrot.lane.b32.xlu1 %v2839_v31, %s4188_s28 }
 0x3e1   : > { %2844 = vrot.lane.b32.xlu1 %v2833_v21, %s4187_s26 }
 0x44b   : > { %v2853_v38 = vpop.permute.xlu0 %2852 }
 0x44c   : > { %v2858_v59 = vsub.f32 %v2826_v19, %v2853_v38  ;;  %v2859_v47 = vsub.f32 %v2828_v51, %v2853_v38 }
 0x44e   : > { %2879 = vrot.lane.b32.xlu0 %v2859_v47, %s4187_s26 }
 0x44f   : > { %v2843_v9 = vpop.permute.xlu0 %2842  ;;  %v2855_v39 = vpop.permute.xlu1 %2854 }
 0x450   : > { %v5223_v11 = vmul.f32 %v2843_v9, %v2826_v19  ;;  %v2860_v44 = vsub.f32 %v2833_v21, %v2855_v39  ;;  %v2861_v49 = vsub.f32 %v2835_v22, %v2855_v39 }
 0x452   : > { %2864 = vrot.lane.b32.xlu0 %v5223_v11, %s4186_s10  ;;  %2881 = vrot.lane.b32.xlu1 %v2861_v49, %s4187_s26  ;;  %v2893_v63 = vmul.f32 2.0, %v5223_v11 }
 0x453   : > { %v2845_v52 = vpop.permute.xlu1 %2844 }
 0x454   : > { %v2849_v58 = vmul.f32 %v2845_v52, %v2833_v21  ;;  %v2896_v41 = vadd.f32 %v2895_v50, %v2893_v63 }
 0x456   : > { %2908 = vrot.lane.b32.xlu0 %v2838_v14, %s4187_s26  ;;  %2866 = vrot.lane.b32.xlu1 %v2849_v58, %s4186_s10  ;;  %v2894_v4 = vmul.f32 2.0, %v2849_v58 }
 0x45a   : > { %2910 = vrot.lane.b32.xlu1 %v2839_v31, %s4187_s26 }
 0x4c0   : > { %v2880_v42 = vpop.permute.xlu0 %2879 }
 0x4c1   : > { %v2885_v34 = vadd.f32 %v2880_v42, %v2858_v59  ;;  %v2886_v35 = vadd.f32 %v2880_v42, %v2859_v47 }
 0x4c3   : > { %v2889_v25 = vadd.f32 %v2885_v34, %v2874_v56  ;;  %v2890_v55 = vadd.f32 %v2886_v35, %v2874_v56 }
 0x4c4   : > { %v2865_v43 = vpop.permute.xlu0 %2864  ;;  %v2882_v48 = vpop.permute.xlu1 %2881 }
 0x4c5   : > { %v2870_v60 = vsub.f32 %v2828_v51, %v2865_v43  ;;  %v2887_v28 = vadd.f32 %v2882_v48, %v2860_v44  ;;  %v2888_v57 = vadd.f32 %v2882_v48, %v2861_v49  ;;  %2924 = vrot.lane.b32.xlu1 %v2890_v55, %s4184_s9  ;;  %2922 = vrot.lane.b32.xlu0 %v2889_v25, %s4184_s9 }
 0x4c6   : > { %v2897_v51 = vadd.f32 %v2895_v50, %v2894_v4 }
 0x4c7   : > { %v2872_v37 = vmul.f32 2.0, %v2870_v60  ;;  %v2891_v46 = vadd.f32 %v2887_v28, %v2874_v56  ;;  %v2892_v0 = vadd.f32 %v2888_v57, %v2874_v56 }
 0x4c8   : > { %v2867_v61 = vpop.permute.xlu1 %2866  ;;  %v2909_v32 = vpop.permute.xlu0 %2908 }
 0x4c9   : > { %v2871_v8 = vsub.f32 %v2835_v22, %v2867_v61  ;;  %2928 = vrot.lane.b32.xlu1 %v2892_v0, %s4184_s9  ;;  %2926 = vrot.lane.b32.xlu0 %v2891_v46, %s4184_s9  ;;  %v2875_v1 = vadd.f32 %v2874_v56, %v2872_v37  ;;  %v2914_v13 = vadd.f32 %v2909_v32, %v2838_v14 }
 0x4cb   : > { %v2873_v2 = vmul.f32 2.0, %v2871_v8  ;;  %v2916_v10 = vadd.f32 %v2914_v13, %v2895_v50 }
 0x4cc   : > { %v2911_v15 = vpop.permute.xlu1 %2910 }
 0x4cd   : > { %v2876_v16 = vadd.f32 %v2874_v56, %v2873_v2  ;;  %2900 = vrot.lane.b32.xlu0 %v2875_v1, %s4186_s10  ;;  %v2915_v29 = vadd.f32 %v2911_v15, %v2839_v31 }
 0x4cf   : > { %2902 = vrot.lane.b32.xlu1 %v2876_v16, %s4186_s10  ;;  %v2917_v12 = vadd.f32 %v2915_v29, %v2895_v50 }
 0x4d1   : > { %3954 = vrot.lane.b32.xlu0 %v3953_v26, %s4183_s29  ;;  %s4102_s29 = scalar_lea.vmem %s4101_s27, 256 }
 0x4d2   : > { %p4104_p3 = scmp.lt.s32.totalorder %s4102_s29, %s4096_s25 }
 0x4d3   : > { %3959 = vrot.lane.b32.xlu1 %v3953_v26, %s4184_s9 }
 0x4d4   : > { %p4105_p6 = por %p4104_p3, %p4103_p13 }
 0x4d6   : > { %p4106_p7 = pnand %p4105_p6, %p4099_p11 }
 0x537   : > { %v2925_v23 = vpop.permute.xlu1 %2924  ;;  %v2923_v18 = vpop.permute.xlu0 %2922 }
 0x538   : > { %v2930_v24 = vsel %vm2262_vm1, %v2923_v18, %v2925_v23 }
 0x539   : > { %v2934_v45 = vmul.f32 %v2930_v24, %v2916_v10 }
 0x53b   : > { %3963 = vrcp.f32 %v2934_v45  ;;  %v2929_v36 = vpop.permute.xlu1 %2928  ;;  %v2927_v54 = vpop.permute.xlu0 %2926 }
 0x53c   : > { %v2931_v27 = vsel %vm2262_vm1, %v2927_v54, %v2929_v36 }
 0x53d   : > { %v2935_v53 = vmul.f32 %v2931_v27, %v2917_v12 }
 0x53f   : > { %3965 = vrcp.f32 %v2935_v53  ;;  %v2901_v5 = vpop.permute.xlu0 %2900 }
 0x540   : > { %v2906_v33 = vmul.f32 %v2901_v5, %v2896_v41 }
 0x541   : > { %v2903_v62 = vpop.permute.xlu1 %2902 }
 0x542   : > { %v2907_v47 = vmul.f32 %v2903_v62, %v2897_v51 }
 0x543   : > { %v3955_v3 = vpop.permute.xlu0 %3954 }
 0x544   : > { %v3957_v30 = vunpack.i.h.bf16 %v3955_v3  ;;  %v3956_v40 = vunpack.i.l.bf16 %v3955_v3 }
 0x545   : > { %v3964_v19 = vpop.eup %3963  ;;  %v3960_v14 = vpop.permute.xlu1 %3959 }
 0x546   : > { %v2938_v21 = vmul.f32 %v3964_v19, %v2906_v33  ;;  %v2969_v22 = vsel %vm359_vm0, 0.0, %v3957_v30  ;;  %v2968_v31 = vsel %vm359_vm0, %v3139_v20, %v3956_v40  ;;  %v3962_v38 = vunpack.i.h.bf16 %v3960_v14 }
 0x547   : > { %v3961_v59 = vunpack.i.l.bf16 %v3960_v14 }
 0x548   : > { %v2971_v11 = vsel %vm2262_vm1, %v2969_v22, %v3962_v38 }
 0x549   : > { %v3966_v9 = vpop.eup %3965  ;;  %v2970_v39 = vsel %vm2262_vm1, %v2968_v31, %v3961_v59 }
 0x54a   : > { %v2939_v44 = vmul.f32 %v3966_v9, %v2907_v47  ;;  %v2972_v49 = vmul.f32 %v2970_v39, %v2938_v21 }
 0x54c   : > { %v2973_v52 = vmul.f32 %v2971_v11, %v2939_v44  ;;  %v2974_v58 = vsel %vm2265_vm2, %v2972_v49, 0.0 }
 0x54e   : > { %v2975_v17 = vsel %vm2265_vm2, %v2973_v52, 0.0 }
 0x54f   : > { %v2976_v42 = vadd.f32 %v2975_v17, %v2974_v58 }
 0x551   : > { %2977 = vadd.xlane.f32.xlu0 %v2976_v42 }
 0x5de   : > { %v2978_v56 = vpop.xlane.xlu0 %2977 }
 0x5df   : > { %v2979_v6 = vrot.slane %v2978_v56, 4 }
 0x5e1   : > { %v2980_v7 = vadd.f32 %v2979_v6, %v2978_v56 }
 0x5e3   : > { %v2981_v34 = vrot.slane %v2980_v7, 2 }
 0x5e5   : > { %v2982_v35 = vadd.f32 %v2981_v34, %v2980_v7 }
 0x5e7   : > { %v2983_v25 = vrot.slane %v2982_v35, 1 }
 0x5e9   : > { %v2984_v55 = vadd.f32 %v2983_v25, %v2982_v35 }
 0x5eb   : > { %3859 = vpush %v2984_v55 }
 0x61c   : > { %s3860_s24 = spop %3859 }
 0x61d   : > { %v2986_v43 = vstv %s3860_s24 }
 0x61e   : > { %2987 = vst [vmem:[%s320_s1] sm:$0xff] %v2986_v43 }
 0x61f   : > { %4109 = shalt.err (!%p4106_p7)
}
 0x620   : > { %s4110_s8 = scalar_lea.hbm %s5257_s15, 128  ;;  %s4114_s10 = scalar_lea.hbm %s5304_s5, 256 }
 0x621   : > { %p4111_p9 = scmp.ne.s32.totalorder %s5257_s15, %s4110_s8  ;;  %p4115_p10 = scmp.lt.u32.totalorder %s5257_s15, %s5304_s5 }
 0x622   : > { %p4116_p5 = scmp.lt.u32.totalorder %s4114_s10, %s4110_s8  ;;  %p4118_p4 = scmp.lt.u32.totalorder %s4110_s8, %s5257_s15 }
 0x623   : > { %p4112_p2 = pnand %p4111_p9, %p5433_p8 }
 0x624   : > { %p4117_p1 = por %p4116_p5, %p4115_p10 }
 0x625   : > { %p4113_p0 = pneg %p4112_p2 }
 0x626   : > { %p4119_p12 = por %p4118_p4, %p4117_p1 }
 0x628   : > { %p4120_p11 = pnand %p4119_p12, %p4113_p0 }
 0x62a   : > { %4123 = shalt.err (!%p4120_p11)
}
 0x62b   : > { %3877 = dma.vmem_to_hbm [thread:$0]  (%p5433_p8), %s5252_s23, 128, %s5257_s15, %s2989_s12  }
 0x62c PF: > { %s3014_s14 = sand.u32 1, %s4162_s18   ;;  %p5434_p13 = scmp.ne.s32.totalorder %s5366_s6, 0 }
 0x62d   : > { %p5435_p3 = scmp.ge.s32.totalorder %s4174_s21, 2  ;;  %s3015_s11 = scalar_lea.sflag [#allocation4], %s3014_s14 }
 0x62f   : > { %p3897_p6 = pnand %p5435_p3, %p5434_p13 }
 0x631   : > { %4157 = dma.done.wait (!%p3897_p6), %s3015_s11, 128  }
 0x632   : > { %4159 = vsyncadd (!%p3897_p6), %s3015_s11, 4294967168  ;;  %s5436_s21 = sld [smem:[#allocation18_spill]]  ;;  %s5437_s16 = sld [smem:[#allocation17_spill]] }
 0x633   : > { %s5438_s20 = sld [smem:[#allocation19_spill]]  ;;  %s5439_s18 = smov %s4166_s19 }
 0x638   : > { %p18_p7 = scmp.ge.s32.totalorder %s5436_s21, 4   ;;  %s5440_s19 = smov %s5437_s16 }
 0x63a   :  { %20 = sbr.rel (!%p18_p7) target bundleno = 9 (0x9), region = 108 }
 0x641   :  { %3020 = vsyncpa [#allocation3], 1 }
 0x642   :  { %3022 = vsyncpa [#allocation3 + $0x1], 1 }
 0x643   :  { %3023 = vsyncpa [#allocation8], 1 }
 0x644   :  { %3024 = vsyncpa [#allocation4], 1 }
 0x645   :  { %3026 = vsyncpa [#allocation4 + $0x1], 1 }
 0x646   :  { %3027 = vsyncpa [#allocation5], 1 }
 0x647   :  { %3029 = vsyncpa [#allocation5 + $0x1], 1 }

</bundles_post_ra>
